<compile_context>
chip_gen: v6e
topology: v6e:2x2x1
jax: 0.10.0
libtpu: 0.0.40
codegen_flags: <defaults>
</compile_context>

<pallas_src>
import numpy as np
import jax
import jax.numpy as jnp
from jax.experimental import pallas as pl
from jax.experimental.pallas import tpu as pltpu


def _round_up(a, m):
    return ((a + m - 1) // m) * m


_SUBLANE_ALIGN = {4: 8, 2: 16, 1: 32}   # itemsize -> required sublane multiple


# ---------------------------------------------------------------------------
# Host-side "registration" compile: masks -> minimal static per-op programs.
# ---------------------------------------------------------------------------
def _compile_operators(relations_required_mask, mode_mask):
    req = np.asarray(relations_required_mask, dtype=bool)
    mode = np.asarray(mode_mask, dtype=bool)
    if req.shape != mode.shape or req.ndim != 3 or req.shape[1] != req.shape[2]:
        raise ValueError("masks must both have shape (num_ops, W, W)")
    num_ops, width, _ = req.shape
    if num_ops > 31:
        raise NotImplementedError("bit-packed int32 output supports <= 31 operators")

    const_bits = 0          # bits of operators that always trigger
    pair_ops = []           # list of (op_index, tuple of (i, j, must_match))
    for n in range(num_ops):
        true_pairs, false_pairs = set(), set()
        const_false = False
        for i, j in zip(*np.nonzero(req[n])):
            i, j = int(i), int(j)
            must = bool(mode[n, i, j])
            if i == j:
                if not must:           # x[i] != x[i] is impossible
                    const_false = True
                continue               # diagonal "match": trivially satisfied
            key = (i, j) if i < j else (j, i)
            (true_pairs if must else false_pairs).add(key)

        if const_false or (true_pairs & false_pairs):
            continue                   # operator can never trigger: bit stays 0
        if not true_pairs and not false_pairs:
            const_bits |= 1 << n       # unconstrained operator: always triggers
            continue

        # Transitive reduction of the must-match requirements: the conjunction
        # of all required equalities within a connected component is exactly
        # "all channels in the component are equal", enforceable with a
        # spanning forest of that component.
        parent = {}

        def find(a):
            root = a
            while parent.get(root, root) != root:
                root = parent[root]
            return root

        edges = []
        for i, j in sorted(true_pairs):
            ri, rj = find(i), find(j)
            if ri != rj:
                parent[ri] = rj
                edges.append((i, j, True))
        edges.extend((i, j, False) for i, j in sorted(false_pairs))
        pair_ops.append((n, tuple(edges)))

    return num_ops, width, const_bits, tuple(pair_ops)


# ---------------------------------------------------------------------------
# Kernel
# ---------------------------------------------------------------------------
def _build_kernel(const_bits, pair_ops):
    def kernel(x_ref, out_ref):
        # x_ref  : (W, TILE_R, 128)  channel-major state, 128 batch elems / lane row
        # out_ref: (TILE_R, 128) int32, bit n == 1 iff operator n triggers
        shape = out_ref.shape
        acc = jnp.full(shape, const_bits, dtype=jnp.int32)
        for n, edges in pair_ops:
            sat = None
            for i, j, must in edges:
                a = x_ref[i]                       # (TILE_R, 128), loaded on demand
                b = x_ref[j]
                term = (a == b) if must else (a != b)
                sat = term if sat is None else jnp.logical_and(sat, term)
            acc = acc + jnp.where(sat, jnp.int32(1 << n), jnp.int32(0))
        out_ref[...] = acc
    return kernel


# ---------------------------------------------------------------------------
# Wrapper / factory (forward pass)
# ---------------------------------------------------------------------------
def make_matching_cases_trigger(relations_required_mask, mode_mask, *,
                                max_tile_rows=512, vmem_limit_bytes=32 << 20):
    """Compile MatchingCasesTrigger registration-time masks into a jitted forward.

    NOTE: relations_required_mask / mode_mask are registration-time module
    state and are baked in at trace time; re-registering operators requires
    building a new forward (silent-staleness hazard otherwise).
    """
    num_ops, width, const_bits, pair_ops = _compile_operators(
        relations_required_mask, mode_mask)
    kernel = _build_kernel(const_bits, pair_ops)
    n_terms = sum(len(e) for _, e in pair_ops)

    def _packed_from_channel_major(x_cm):
        """x_cm: (W, rows, 128) channel-major, lane-dense FSM state (rows aligned).

        Returns (rows, 128) int32 bit-packed trigger words.  A producer that
        keeps its FSM state channel-major can call this directly and skip the
        batch-major -> channel-major layout pre-pass entirely.
        """
        w, rows, lanes = x_cm.shape
        assert w == width and lanes == 128
        align = _SUBLANE_ALIGN[x_cm.dtype.itemsize]
        cap = max(align, (max_tile_rows // align) * align)
        tile_rows = min(cap, _round_up(rows, align))
        assert rows % tile_rows == 0, "rows must be a multiple of the tile"
        grid = (rows // tile_rows,)

        cost = pl.CostEstimate(
            flops=2 * rows * 128 * max(n_terms, 1),
            transcendentals=0,
            bytes_accessed=rows * 128 * (width * x_cm.dtype.itemsize + 4),
        )
        return pl.pallas_call(
            kernel,
            out_shape=jax.ShapeDtypeStruct((rows, 128), jnp.int32),
            grid=grid,
            in_specs=[pl.BlockSpec((width, tile_rows, 128), lambda r: (0, r, 0))],
            out_specs=pl.BlockSpec((tile_rows, 128), lambda r: (r, 0)),
            compiler_params=pltpu.CompilerParams(
                dimension_semantics=("parallel",),
                vmem_limit_bytes=vmem_limit_bytes),
            cost_estimate=cost,
        )(x_cm)

    def _forward_impl(tensor):
        if tensor.shape[-1] != width:
            raise ValueError("tensor last dim must equal spec.total_width")
        # TODO(synk): CBTensor.rebind_to_spec / channel pruning is host-side
        # spec-metadata bookkeeping with no Pallas equivalent; the raw backing
        # tensor (already in spec channel order) is consumed directly.
        x = tensor
        if x.dtype == jnp.bool_:
            x = x.astype(jnp.int8)
        elif x.dtype.itemsize > 4:
            # Accepted dtypes are <=32-bit; 64-bit values wider than 32 bits
            # would change equality semantics (JAX x64 is normally disabled).
            x = x.astype(jnp.int32 if jnp.issubdtype(x.dtype, jnp.integer)
                         else jnp.float32)

        batch_shape = x.shape[:-1]
        B = int(np.prod(batch_shape, dtype=np.int64)) if batch_shape else 1
        x = x.reshape(B, width)

        align = _SUBLANE_ALIGN[x.dtype.itemsize]
        cap = max(align, (max_tile_rows // align) * align)
        rows = pl.cdiv(B, 128)
        tile_rows = min(cap, _round_up(rows, align))
        rows_padded = _round_up(rows, tile_rows)
        b_padded = rows_padded * 128

        # Single fused pre-pass (pad + transpose) that builds the channel-major
        # lane-dense layout; everything in this function runs under one jit so
        # the cast above and the bit-unpack below fuse with it.
        if b_padded != B:
            x = jnp.pad(x, ((0, b_padded - B), (0, 0)))
        x_cm = jnp.transpose(x).reshape(width, rows_padded, 128)

        packed = _packed_from_channel_major(x_cm)
        packed = packed.reshape(b_padded)[:B]
        bits = (packed[:, None] >> jnp.arange(num_ops, dtype=jnp.int32)) & 1
        return bits.astype(jnp.bool_).reshape(batch_shape + (num_ops,))

    _fwd = jax.jit(_forward_impl)

    def forward(tensor):
        """tensor: (..., W) FSM state -> (..., num_ops) bool trigger mask."""
        return _fwd(jnp.asarray(tensor))

    forward.packed_from_channel_major = _packed_from_channel_major
    return forward


def matching_cases_trigger_forward(tensor, relations_required_mask, mode_mask,
                                   **kwargs):
    """One-shot convenience wrapper (prefer make_matching_cases_trigger)."""
    return make_matching_cases_trigger(relations_required_mask, mode_mask,
                                       **kwargs)(tensor)


# ---------------------------------------------------------------------------
# Demo / correctness check
# ---------------------------------------------------------------------------
def _register_trigger_masks(slices, widths, total_width, ch_a, ch_b, modes):
    """Mirror of MatchingCasesTrigger.register_trigger (mask construction)."""
    relations = np.zeros((total_width, total_width), dtype=bool)
    mode = np.zeros((total_width, total_width), dtype=bool)
    for a, b, m in zip(ch_a, ch_b, modes):
        assert widths[a] == widths[b]
        relations[slices[a], slices[b]] = True
        mode[slices[a], slices[b]] = m
    return relations, mode


def _reference_forward(tensor, req, mode):
    """Pure-JAX mirror of the PyTorch forward."""
    eq = tensor[..., :, None] == tensor[..., None, :]                    # (..., W, W)
    ip = jnp.logical_not(jnp.logical_xor(eq[..., None, :, :], mode))     # (..., N, W, W)
    ip = jnp.where(req, ip, True)
    return ip.reshape(ip.shape[:-2] + (-1,)).all(axis=-1)                # (..., N)


if __name__ == "__main__":
    key = jax.random.PRNGKey(0)

    # CBTensorSpec stand-in: channel -> width, channels laid out consecutively.
    channel_widths = {"state": 4, "mode": 4, "data": 8}
    total_width = sum(channel_widths.values())            # 16
    slices, off = {}, 0
    for name, w in channel_widths.items():
        slices[name] = slice(off, off + w)
        off += w

    # 8 registered FSM operators -> per-operator (channel_a, channel_b, match?)
    # lists, exactly as MatchingCasesTrigger.register_operator would add them.
    operator_triggers = [
        ([], [], []),                                             # no matching triggers
        (["state"], ["mode"], [True]),                            # state must match mode
        (["state"], ["mode"], [False]),                           # state must NOT match mode
        (["data"], ["data"], [True]),                             # data internally constant
        (["state", "state"], ["state", "mode"], [True, False]),
        (["mode"], ["state"], [False]),
        (["mode"], ["mode"], [True]),
        (["state", "mode"], ["mode", "state"], [True, True]),
    ]
    rel, mod = [], []
    for ch_a, ch_b, modes in operator_triggers:
        r, m = _register_trigger_masks(slices, channel_widths, total_width,
                                       ch_a, ch_b, modes)
        rel.append(r)
        mod.append(m)
    relations_required_mask = np.stack(rel, axis=0)        # (8, 16, 16) bool
    mode_mask = np.stack(mod, axis=0)                      # (8, 16, 16) bool

    # FSM state tensor: batch (2, 4, 16), total_width channels, small int values
    # so that match / no-match conditions both occur.
    state = jax.random.randint(key, (2, 4, 16, total_width), 0, 3, dtype=jnp.int32)

    forward = make_matching_cases_trigger(relations_required_mask, mode_mask)

    out = jax.block_until_ready(forward(state))
    ref = _reference_forward(state, jnp.asarray(relations_required_mask),
                             jnp.asarray(mode_mask))
    assert out.shape == state.shape[:-1] + (relations_required_mask.shape[0],)
    assert out.dtype == jnp.bool_
    assert bool(jnp.all(out == ref))

    # Narrow-dtype path (values fit in int8): DMA + compares stay int8, no upcast.
    out8 = jax.block_until_ready(forward(state.astype(jnp.int8)))
    assert bool(jnp.all(out8 == ref))

    print("KERNEL_OK")
</pallas_src>

<mosaic_0001>
module attributes {stable_mosaic.version = 11 : i64} {
  func.func @kernel(%arg0: i32, %arg1: memref<16x8x128xi32, #tpu.memory_space<vmem>>, %arg2: memref<8x128xi32, #tpu.memory_space<vmem>>) attributes {dimension_semantics = [#tpu.dimension_semantics<parallel>], iteration_bounds = array<i64: 1>, scalar_prefetch = 0 : i64, scratch_operands = 0 : i64, tpu.core_type = #tpu.core_type<tc>, window_params = [{transform_indices = @transform_0, window_bounds = array<i64: 16, 8, 128>}, {transform_indices = @transform_1, window_bounds = array<i64: 8, 128>}]} {
    %c1_i32 = arith.constant 1 : i32
    %0 = vector.broadcast %c1_i32 : i32 to vector<8x128xi32>
    %c0 = arith.constant 0 : index
    %c0_0 = arith.constant 0 : index
    %c0_1 = arith.constant 0 : index
    %1 = vector.load %arg1[%c0, %c0_0, %c0_1] : memref<16x8x128xi32, #tpu.memory_space<vmem>>, vector<1x8x128xi32>
    %2 = vector.shape_cast %1 : vector<1x8x128xi32> to vector<8x128xi32>
    %c4 = arith.constant 4 : index
    %c0_2 = arith.constant 0 : index
    %c0_3 = arith.constant 0 : index
    %3 = vector.load %arg1[%c4, %c0_2, %c0_3] : memref<16x8x128xi32, #tpu.memory_space<vmem>>, vector<1x8x128xi32>
    %4 = vector.shape_cast %3 : vector<1x8x128xi32> to vector<8x128xi32>
    %5 = arith.cmpi eq, %2, %4 : vector<8x128xi32>
    %c0_4 = arith.constant 0 : index
    %c0_5 = arith.constant 0 : index
    %c0_6 = arith.constant 0 : index
    %6 = vector.load %arg1[%c0_4, %c0_5, %c0_6] : memref<16x8x128xi32, #tpu.memory_space<vmem>>, vector<1x8x128xi32>
    %7 = vector.shape_cast %6 : vector<1x8x128xi32> to vector<8x128xi32>
    %c5 = arith.constant 5 : index
    %c0_7 = arith.constant 0 : index
    %c0_8 = arith.constant 0 : index
    %8 = vector.load %arg1[%c5, %c0_7, %c0_8] : memref<16x8x128xi32, #tpu.memory_space<vmem>>, vector<1x8x128xi32>
    %9 = vector.shape_cast %8 : vector<1x8x128xi32> to vector<8x128xi32>
    %10 = arith.cmpi eq, %7, %9 : vector<8x128xi32>
    %11 = arith.andi %5, %10 : vector<8x128xi1>
    %c0_9 = arith.constant 0 : index
    %c0_10 = arith.constant 0 : index
    %c0_11 = arith.constant 0 : index
    %12 = vector.load %arg1[%c0_9, %c0_10, %c0_11] : memref<16x8x128xi32, #tpu.memory_space<vmem>>, vector<1x8x128xi32>
    %13 = vector.shape_cast %12 : vector<1x8x128xi32> to vector<8x128xi32>
    %c6 = arith.constant 6 : index
    %c0_12 = arith.constant 0 : index
    %c0_13 = arith.constant 0 : index
    %14 = vector.load %arg1[%c6, %c0_12, %c0_13] : memref<16x8x128xi32, #tpu.memory_space<vmem>>, vector<1x8x128xi32>
    %15 = vector.shape_cast %14 : vector<1x8x128xi32> to vector<8x128xi32>
    %16 = arith.cmpi eq, %13, %15 : vector<8x128xi32>
    %17 = arith.andi %11, %16 : vector<8x128xi1>
    %c0_14 = arith.constant 0 : index
    %c0_15 = arith.constant 0 : index
    %c0_16 = arith.constant 0 : index
    %18 = vector.load %arg1[%c0_14, %c0_15, %c0_16] : memref<16x8x128xi32, #tpu.memory_space<vmem>>, vector<1x8x128xi32>
    %19 = vector.shape_cast %18 : vector<1x8x128xi32> to vector<8x128xi32>
    %c7 = arith.constant 7 : index
    %c0_17 = arith.constant 0 : index
    %c0_18 = arith.constant 0 : index
    %20 = vector.load %arg1[%c7, %c0_17, %c0_18] : memref<16x8x128xi32, #tpu.memory_space<vmem>>, vector<1x8x128xi32>
    %21 = vector.shape_cast %20 : vector<1x8x128xi32> to vector<8x128xi32>
    %22 = arith.cmpi eq, %19, %21 : vector<8x128xi32>
    %23 = arith.andi %17, %22 : vector<8x128xi1>
    %c1 = arith.constant 1 : index
    %c0_19 = arith.constant 0 : index
    %c0_20 = arith.constant 0 : index
    %24 = vector.load %arg1[%c1, %c0_19, %c0_20] : memref<16x8x128xi32, #tpu.memory_space<vmem>>, vector<1x8x128xi32>
    %25 = vector.shape_cast %24 : vector<1x8x128xi32> to vector<8x128xi32>
    %c4_21 = arith.constant 4 : index
    %c0_22 = arith.constant 0 : index
    %c0_23 = arith.constant 0 : index
    %26 = vector.load %arg1[%c4_21, %c0_22, %c0_23] : memref<16x8x128xi32, #tpu.memory_space<vmem>>, vector<1x8x128xi32>
    %27 = vector.shape_cast %26 : vector<1x8x128xi32> to vector<8x128xi32>
    %28 = arith.cmpi eq, %25, %27 : vector<8x128xi32>
    %29 = arith.andi %23, %28 : vector<8x128xi1>
    %c2 = arith.constant 2 : index
    %c0_24 = arith.constant 0 : index
    %c0_25 = arith.constant 0 : index
    %30 = vector.load %arg1[%c2, %c0_24, %c0_25] : memref<16x8x128xi32, #tpu.memory_space<vmem>>, vector<1x8x128xi32>
    %31 = vector.shape_cast %30 : vector<1x8x128xi32> to vector<8x128xi32>
    %c4_26 = arith.constant 4 : index
    %c0_27 = arith.constant 0 : index
    %c0_28 = arith.constant 0 : index
    %32 = vector.load %arg1[%c4_26, %c0_27, %c0_28] : memref<16x8x128xi32, #tpu.memory_space<vmem>>, vector<1x8x128xi32>
    %33 = vector.shape_cast %32 : vector<1x8x128xi32> to vector<8x128xi32>
    %34 = arith.cmpi eq, %31, %33 : vector<8x128xi32>
    %35 = arith.andi %29, %34 : vector<8x128xi1>
    %c3 = arith.constant 3 : index
    %c0_29 = arith.constant 0 : index
    %c0_30 = arith.constant 0 : index
    %36 = vector.load %arg1[%c3, %c0_29, %c0_30] : memref<16x8x128xi32, #tpu.memory_space<vmem>>, vector<1x8x128xi32>
    %37 = vector.shape_cast %36 : vector<1x8x128xi32> to vector<8x128xi32>
    %c4_31 = arith.constant 4 : index
    %c0_32 = arith.constant 0 : index
    %c0_33 = arith.constant 0 : index
    %38 = vector.load %arg1[%c4_31, %c0_32, %c0_33] : memref<16x8x128xi32, #tpu.memory_space<vmem>>, vector<1x8x128xi32>
    %39 = vector.shape_cast %38 : vector<1x8x128xi32> to vector<8x128xi32>
    %40 = arith.cmpi eq, %37, %39 : vector<8x128xi32>
    %41 = arith.andi %35, %40 : vector<8x128xi1>
    %c2_i32 = arith.constant 2 : i32
    %c0_i32 = arith.constant 0 : i32
    %42 = vector.broadcast %c2_i32 : i32 to vector<8x128xi32>
    %43 = vector.broadcast %c0_i32 : i32 to vector<8x128xi32>
    %44 = arith.select %41, %42, %43 : vector<8x128xi1>, vector<8x128xi32>
    %45 = arith.addi %0, %44 : vector<8x128xi32>
    %c0_34 = arith.constant 0 : index
    %c0_35 = arith.constant 0 : index
    %c0_36 = arith.constant 0 : index
    %46 = vector.load %arg1[%c0_34, %c0_35, %c0_36] : memref<16x8x128xi32, #tpu.memory_space<vmem>>, vector<1x8x128xi32>
    %47 = vector.shape_cast %46 : vector<1x8x128xi32> to vector<8x128xi32>
    %c4_37 = arith.constant 4 : index
    %c0_38 = arith.constant 0 : index
    %c0_39 = arith.constant 0 : index
    %48 = vector.load %arg1[%c4_37, %c0_38, %c0_39] : memref<16x8x128xi32, #tpu.memory_space<vmem>>, vector<1x8x128xi32>
    %49 = vector.shape_cast %48 : vector<1x8x128xi32> to vector<8x128xi32>
    %50 = arith.cmpi ne, %47, %49 : vector<8x128xi32>
    %c0_40 = arith.constant 0 : index
    %c0_41 = arith.constant 0 : index
    %c0_42 = arith.constant 0 : index
    %51 = vector.load %arg1[%c0_40, %c0_41, %c0_42] : memref<16x8x128xi32, #tpu.memory_space<vmem>>, vector<1x8x128xi32>
    %52 = vector.shape_cast %51 : vector<1x8x128xi32> to vector<8x128xi32>
    %c5_43 = arith.constant 5 : index
    %c0_44 = arith.constant 0 : index
    %c0_45 = arith.constant 0 : index
    %53 = vector.load %arg1[%c5_43, %c0_44, %c0_45] : memref<16x8x128xi32, #tpu.memory_space<vmem>>, vector<1x8x128xi32>
    %54 = vector.shape_cast %53 : vector<1x8x128xi32> to vector<8x128xi32>
    %55 = arith.cmpi ne, %52, %54 : vector<8x128xi32>
    %56 = arith.andi %50, %55 : vector<8x128xi1>
    %c0_46 = arith.constant 0 : index
    %c0_47 = arith.constant 0 : index
    %c0_48 = arith.constant 0 : index
    %57 = vector.load %arg1[%c0_46, %c0_47, %c0_48] : memref<16x8x128xi32, #tpu.memory_space<vmem>>, vector<1x8x128xi32>
    %58 = vector.shape_cast %57 : vector<1x8x128xi32> to vector<8x128xi32>
    %c6_49 = arith.constant 6 : index
    %c0_50 = arith.constant 0 : index
    %c0_51 = arith.constant 0 : index
    %59 = vector.load %arg1[%c6_49, %c0_50, %c0_51] : memref<16x8x128xi32, #tpu.memory_space<vmem>>, vector<1x8x128xi32>
    %60 = vector.shape_cast %59 : vector<1x8x128xi32> to vector<8x128xi32>
    %61 = arith.cmpi ne, %58, %60 : vector<8x128xi32>
    %62 = arith.andi %56, %61 : vector<8x128xi1>
    %c0_52 = arith.constant 0 : index
    %c0_53 = arith.constant 0 : index
    %c0_54 = arith.constant 0 : index
    %63 = vector.load %arg1[%c0_52, %c0_53, %c0_54] : memref<16x8x128xi32, #tpu.memory_space<vmem>>, vector<1x8x128xi32>
    %64 = vector.shape_cast %63 : vector<1x8x128xi32> to vector<8x128xi32>
    %c7_55 = arith.constant 7 : index
    %c0_56 = arith.constant 0 : index
    %c0_57 = arith.constant 0 : index
    %65 = vector.load %arg1[%c7_55, %c0_56, %c0_57] : memref<16x8x128xi32, #tpu.memory_space<vmem>>, vector<1x8x128xi32>
    %66 = vector.shape_cast %65 : vector<1x8x128xi32> to vector<8x128xi32>
    %67 = arith.cmpi ne, %64, %66 : vector<8x128xi32>
    %68 = arith.andi %62, %67 : vector<8x128xi1>
    %c1_58 = arith.constant 1 : index
    %c0_59 = arith.constant 0 : index
    %c0_60 = arith.constant 0 : index
    %69 = vector.load %arg1[%c1_58, %c0_59, %c0_60] : memref<16x8x128xi32, #tpu.memory_space<vmem>>, vector<1x8x128xi32>
    %70 = vector.shape_cast %69 : vector<1x8x128xi32> to vector<8x128xi32>
    %c4_61 = arith.constant 4 : index
    %c0_62 = arith.constant 0 : index
    %c0_63 = arith.constant 0 : index
    %71 = vector.load %arg1[%c4_61, %c0_62, %c0_63] : memref<16x8x128xi32, #tpu.memory_space<vmem>>, vector<1x8x128xi32>
    %72 = vector.shape_cast %71 : vector<1x8x128xi32> to vector<8x128xi32>
    %73 = arith.cmpi ne, %70, %72 : vector<8x128xi32>
    %74 = arith.andi %68, %73 : vector<8x128xi1>
    %c1_64 = arith.constant 1 : index
    %c0_65 = arith.constant 0 : index
    %c0_66 = arith.constant 0 : index
    %75 = vector.load %arg1[%c1_64, %c0_65, %c0_66] : memref<16x8x128xi32, #tpu.memory_space<vmem>>, vector<1x8x128xi32>
    %76 = vector.shape_cast %75 : vector<1x8x128xi32> to vector<8x128xi32>
    %c5_67 = arith.constant 5 : index
    %c0_68 = arith.constant 0 : index
    %c0_69 = arith.constant 0 : index
    %77 = vector.load %arg1[%c5_67, %c0_68, %c0_69] : memref<16x8x128xi32, #tpu.memory_space<vmem>>, vector<1x8x128xi32>
    %78 = vector.shape_cast %77 : vector<1x8x128xi32> to vector<8x128xi32>
    %79 = arith.cmpi ne, %76, %78 : vector<8x128xi32>
    %80 = arith.andi %74, %79 : vector<8x128xi1>
    %c1_70 = arith.constant 1 : index
    %c0_71 = arith.constant 0 : index
    %c0_72 = arith.constant 0 : index
    %81 = vector.load %arg1[%c1_70, %c0_71, %c0_72] : memref<16x8x128xi32, #tpu.memory_space<vmem>>, vector<1x8x128xi32>
    %82 = vector.shape_cast %81 : vector<1x8x128xi32> to vector<8x128xi32>
    %c6_73 = arith.constant 6 : index
    %c0_74 = arith.constant 0 : index
    %c0_75 = arith.constant 0 : index
    %83 = vector.load %arg1[%c6_73, %c0_74, %c0_75] : memref<16x8x128xi32, #tpu.memory_space<vmem>>, vector<1x8x128xi32>
    %84 = vector.shape_cast %83 : vector<1x8x128xi32> to vector<8x128xi32>
    %85 = arith.cmpi ne, %82, %84 : vector<8x128xi32>
    %86 = arith.andi %80, %85 : vector<8x128xi1>
    %c1_76 = arith.constant 1 : index
    %c0_77 = arith.constant 0 : index
    %c0_78 = arith.constant 0 : index
    %87 = vector.load %arg1[%c1_76, %c0_77, %c0_78] : memref<16x8x128xi32, #tpu.memory_space<vmem>>, vector<1x8x128xi32>
    %88 = vector.shape_cast %87 : vector<1x8x128xi32> to vector<8x128xi32>
    %c7_79 = arith.constant 7 : index
    %c0_80 = arith.constant 0 : index
    %c0_81 = arith.constant 0 : index
    %89 = vector.load %arg1[%c7_79, %c0_80, %c0_81] : memref<16x8x128xi32, #tpu.memory_space<vmem>>, vector<1x8x128xi32>
    %90 = vector.shape_cast %89 : vector<1x8x128xi32> to vector<8x128xi32>
    %91 = arith.cmpi ne, %88, %90 : vector<8x128xi32>
    %92 = arith.andi %86, %91 : vector<8x128xi1>
    %c2_82 = arith.constant 2 : index
    %c0_83 = arith.constant 0 : index
    %c0_84 = arith.constant 0 : index
    %93 = vector.load %arg1[%c2_82, %c0_83, %c0_84] : memref<16x8x128xi32, #tpu.memory_space<vmem>>, vector<1x8x128xi32>
    %94 = vector.shape_cast %93 : vector<1x8x128xi32> to vector<8x128xi32>
    %c4_85 = arith.constant 4 : index
    %c0_86 = arith.constant 0 : index
    %c0_87 = arith.constant 0 : index
    %95 = vector.load %arg1[%c4_85, %c0_86, %c0_87] : memref<16x8x128xi32, #tpu.memory_space<vmem>>, vector<1x8x128xi32>
    %96 = vector.shape_cast %95 : vector<1x8x128xi32> to vector<8x128xi32>
    %97 = arith.cmpi ne, %94, %96 : vector<8x128xi32>
    %98 = arith.andi %92, %97 : vector<8x128xi1>
    %c2_88 = arith.constant 2 : index
    %c0_89 = arith.constant 0 : index
    %c0_90 = arith.constant 0 : index
    %99 = vector.load %arg1[%c2_88, %c0_89, %c0_90] : memref<16x8x128xi32, #tpu.memory_space<vmem>>, vector<1x8x128xi32>
    %100 = vector.shape_cast %99 : vector<1x8x128xi32> to vector<8x128xi32>
    %c5_91 = arith.constant 5 : index
    %c0_92 = arith.constant 0 : index
    %c0_93 = arith.constant 0 : index
    %101 = vector.load %arg1[%c5_91, %c0_92, %c0_93] : memref<16x8x128xi32, #tpu.memory_space<vmem>>, vector<1x8x128xi32>
    %102 = vector.shape_cast %101 : vector<1x8x128xi32> to vector<8x128xi32>
    %103 = arith.cmpi ne, %100, %102 : vector<8x128xi32>
    %104 = arith.andi %98, %103 : vector<8x128xi1>
    %c2_94 = arith.constant 2 : index
    %c0_95 = arith.constant 0 : index
    %c0_96 = arith.constant 0 : index
    %105 = vector.load %arg1[%c2_94, %c0_95, %c0_96] : memref<16x8x128xi32, #tpu.memory_space<vmem>>, vector<1x8x128xi32>
    %106 = vector.shape_cast %105 : vector<1x8x128xi32> to vector<8x128xi32>
    %c6_97 = arith.constant 6 : index
    %c0_98 = arith.constant 0 : index
    %c0_99 = arith.constant 0 : index
    %107 = vector.load %arg1[%c6_97, %c0_98, %c0_99] : memref<16x8x128xi32, #tpu.memory_space<vmem>>, vector<1x8x128xi32>
    %108 = vector.shape_cast %107 : vector<1x8x128xi32> to vector<8x128xi32>
    %109 = arith.cmpi ne, %106, %108 : vector<8x128xi32>
    %110 = arith.andi %104, %109 : vector<8x128xi1>
    %c2_100 = arith.constant 2 : index
    %c0_101 = arith.constant 0 : index
    %c0_102 = arith.constant 0 : index
    %111 = vector.load %arg1[%c2_100, %c0_101, %c0_102] : memref<16x8x128xi32, #tpu.memory_space<vmem>>, vector<1x8x128xi32>
    %112 = vector.shape_cast %111 : vector<1x8x128xi32> to vector<8x128xi32>
    %c7_103 = arith.constant 7 : index
    %c0_104 = arith.constant 0 : index
    %c0_105 = arith.constant 0 : index
    %113 = vector.load %arg1[%c7_103, %c0_104, %c0_105] : memref<16x8x128xi32, #tpu.memory_space<vmem>>, vector<1x8x128xi32>
    %114 = vector.shape_cast %113 : vector<1x8x128xi32> to vector<8x128xi32>
    %115 = arith.cmpi ne, %112, %114 : vector<8x128xi32>
    %116 = arith.andi %110, %115 : vector<8x128xi1>
    %c3_106 = arith.constant 3 : index
    %c0_107 = arith.constant 0 : index
    %c0_108 = arith.constant 0 : index
    %117 = vector.load %arg1[%c3_106, %c0_107, %c0_108] : memref<16x8x128xi32, #tpu.memory_space<vmem>>, vector<1x8x128xi32>
    %118 = vector.shape_cast %117 : vector<1x8x128xi32> to vector<8x128xi32>
    %c4_109 = arith.constant 4 : index
    %c0_110 = arith.constant 0 : index
    %c0_111 = arith.constant 0 : index
    %119 = vector.load %arg1[%c4_109, %c0_110, %c0_111] : memref<16x8x128xi32, #tpu.memory_space<vmem>>, vector<1x8x128xi32>
    %120 = vector.shape_cast %119 : vector<1x8x128xi32> to vector<8x128xi32>
    %121 = arith.cmpi ne, %118, %120 : vector<8x128xi32>
    %122 = arith.andi %116, %121 : vector<8x128xi1>
    %c3_112 = arith.constant 3 : index
    %c0_113 = arith.constant 0 : index
    %c0_114 = arith.constant 0 : index
    %123 = vector.load %arg1[%c3_112, %c0_113, %c0_114] : memref<16x8x128xi32, #tpu.memory_space<vmem>>, vector<1x8x128xi32>
    %124 = vector.shape_cast %123 : vector<1x8x128xi32> to vector<8x128xi32>
    %c5_115 = arith.constant 5 : index
    %c0_116 = arith.constant 0 : index
    %c0_117 = arith.constant 0 : index
    %125 = vector.load %arg1[%c5_115, %c0_116, %c0_117] : memref<16x8x128xi32, #tpu.memory_space<vmem>>, vector<1x8x128xi32>
    %126 = vector.shape_cast %125 : vector<1x8x128xi32> to vector<8x128xi32>
    %127 = arith.cmpi ne, %124, %126 : vector<8x128xi32>
    %128 = arith.andi %122, %127 : vector<8x128xi1>
    %c3_118 = arith.constant 3 : index
    %c0_119 = arith.constant 0 : index
    %c0_120 = arith.constant 0 : index
    %129 = vector.load %arg1[%c3_118, %c0_119, %c0_120] : memref<16x8x128xi32, #tpu.memory_space<vmem>>, vector<1x8x128xi32>
    %130 = vector.shape_cast %129 : vector<1x8x128xi32> to vector<8x128xi32>
    %c6_121 = arith.constant 6 : index
    %c0_122 = arith.constant 0 : index
    %c0_123 = arith.constant 0 : index
    %131 = vector.load %arg1[%c6_121, %c0_122, %c0_123] : memref<16x8x128xi32, #tpu.memory_space<vmem>>, vector<1x8x128xi32>
    %132 = vector.shape_cast %131 : vector<1x8x128xi32> to vector<8x128xi32>
    %133 = arith.cmpi ne, %130, %132 : vector<8x128xi32>
    %134 = arith.andi %128, %133 : vector<8x128xi1>
    %c3_124 = arith.constant 3 : index
    %c0_125 = arith.constant 0 : index
    %c0_126 = arith.constant 0 : index
    %135 = vector.load %arg1[%c3_124, %c0_125, %c0_126] : memref<16x8x128xi32, #tpu.memory_space<vmem>>, vector<1x8x128xi32>
    %136 = vector.shape_cast %135 : vector<1x8x128xi32> to vector<8x128xi32>
    %c7_127 = arith.constant 7 : index
    %c0_128 = arith.constant 0 : index
    %c0_129 = arith.constant 0 : index
    %137 = vector.load %arg1[%c7_127, %c0_128, %c0_129] : memref<16x8x128xi32, #tpu.memory_space<vmem>>, vector<1x8x128xi32>
    %138 = vector.shape_cast %137 : vector<1x8x128xi32> to vector<8x128xi32>
    %139 = arith.cmpi ne, %136, %138 : vector<8x128xi32>
    %140 = arith.andi %134, %139 : vector<8x128xi1>
    %c4_i32 = arith.constant 4 : i32
    %c0_i32_130 = arith.constant 0 : i32
    %141 = vector.broadcast %c4_i32 : i32 to vector<8x128xi32>
    %142 = vector.broadcast %c0_i32_130 : i32 to vector<8x128xi32>
    %143 = arith.select %140, %141, %142 : vector<8x128xi1>, vector<8x128xi32>
    %144 = arith.addi %45, %143 : vector<8x128xi32>
    %c8 = arith.constant 8 : index
    %c0_131 = arith.constant 0 : index
    %c0_132 = arith.constant 0 : index
    %145 = vector.load %arg1[%c8, %c0_131, %c0_132] : memref<16x8x128xi32, #tpu.memory_space<vmem>>, vector<1x8x128xi32>
    %146 = vector.shape_cast %145 : vector<1x8x128xi32> to vector<8x128xi32>
    %c9 = arith.constant 9 : index
    %c0_133 = arith.constant 0 : index
    %c0_134 = arith.constant 0 : index
    %147 = vector.load %arg1[%c9, %c0_133, %c0_134] : memref<16x8x128xi32, #tpu.memory_space<vmem>>, vector<1x8x128xi32>
    %148 = vector.shape_cast %147 : vector<1x8x128xi32> to vector<8x128xi32>
    %149 = arith.cmpi eq, %146, %148 : vector<8x128xi32>
    %c8_135 = arith.constant 8 : index
    %c0_136 = arith.constant 0 : index
    %c0_137 = arith.constant 0 : index
    %150 = vector.load %arg1[%c8_135, %c0_136, %c0_137] : memref<16x8x128xi32, #tpu.memory_space<vmem>>, vector<1x8x128xi32>
    %151 = vector.shape_cast %150 : vector<1x8x128xi32> to vector<8x128xi32>
    %c10 = arith.constant 10 : index
    %c0_138 = arith.constant 0 : index
    %c0_139 = arith.constant 0 : index
    %152 = vector.load %arg1[%c10, %c0_138, %c0_139] : memref<16x8x128xi32, #tpu.memory_space<vmem>>, vector<1x8x128xi32>
    %153 = vector.shape_cast %152 : vector<1x8x128xi32> to vector<8x128xi32>
    %154 = arith.cmpi eq, %151, %153 : vector<8x128xi32>
    %155 = arith.andi %149, %154 : vector<8x128xi1>
    %c8_140 = arith.constant 8 : index
    %c0_141 = arith.constant 0 : index
    %c0_142 = arith.constant 0 : index
    %156 = vector.load %arg1[%c8_140, %c0_141, %c0_142] : memref<16x8x128xi32, #tpu.memory_space<vmem>>, vector<1x8x128xi32>
    %157 = vector.shape_cast %156 : vector<1x8x128xi32> to vector<8x128xi32>
    %c11 = arith.constant 11 : index
    %c0_143 = arith.constant 0 : index
    %c0_144 = arith.constant 0 : index
    %158 = vector.load %arg1[%c11, %c0_143, %c0_144] : memref<16x8x128xi32, #tpu.memory_space<vmem>>, vector<1x8x128xi32>
    %159 = vector.shape_cast %158 : vector<1x8x128xi32> to vector<8x128xi32>
    %160 = arith.cmpi eq, %157, %159 : vector<8x128xi32>
    %161 = arith.andi %155, %160 : vector<8x128xi1>
    %c8_145 = arith.constant 8 : index
    %c0_146 = arith.constant 0 : index
    %c0_147 = arith.constant 0 : index
    %162 = vector.load %arg1[%c8_145, %c0_146, %c0_147] : memref<16x8x128xi32, #tpu.memory_space<vmem>>, vector<1x8x128xi32>
    %163 = vector.shape_cast %162 : vector<1x8x128xi32> to vector<8x128xi32>
    %c12 = arith.constant 12 : index
    %c0_148 = arith.constant 0 : index
    %c0_149 = arith.constant 0 : index
    %164 = vector.load %arg1[%c12, %c0_148, %c0_149] : memref<16x8x128xi32, #tpu.memory_space<vmem>>, vector<1x8x128xi32>
    %165 = vector.shape_cast %164 : vector<1x8x128xi32> to vector<8x128xi32>
    %166 = arith.cmpi eq, %163, %165 : vector<8x128xi32>
    %167 = arith.andi %161, %166 : vector<8x128xi1>
    %c8_150 = arith.constant 8 : index
    %c0_151 = arith.constant 0 : index
    %c0_152 = arith.constant 0 : index
    %168 = vector.load %arg1[%c8_150, %c0_151, %c0_152] : memref<16x8x128xi32, #tpu.memory_space<vmem>>, vector<1x8x128xi32>
    %169 = vector.shape_cast %168 : vector<1x8x128xi32> to vector<8x128xi32>
    %c13 = arith.constant 13 : index
    %c0_153 = arith.constant 0 : index
    %c0_154 = arith.constant 0 : index
    %170 = vector.load %arg1[%c13, %c0_153, %c0_154] : memref<16x8x128xi32, #tpu.memory_space<vmem>>, vector<1x8x128xi32>
    %171 = vector.shape_cast %170 : vector<1x8x128xi32> to vector<8x128xi32>
    %172 = arith.cmpi eq, %169, %171 : vector<8x128xi32>
    %173 = arith.andi %167, %172 : vector<8x128xi1>
    %c8_155 = arith.constant 8 : index
    %c0_156 = arith.constant 0 : index
    %c0_157 = arith.constant 0 : index
    %174 = vector.load %arg1[%c8_155, %c0_156, %c0_157] : memref<16x8x128xi32, #tpu.memory_space<vmem>>, vector<1x8x128xi32>
    %175 = vector.shape_cast %174 : vector<1x8x128xi32> to vector<8x128xi32>
    %c14 = arith.constant 14 : index
    %c0_158 = arith.constant 0 : index
    %c0_159 = arith.constant 0 : index
    %176 = vector.load %arg1[%c14, %c0_158, %c0_159] : memref<16x8x128xi32, #tpu.memory_space<vmem>>, vector<1x8x128xi32>
    %177 = vector.shape_cast %176 : vector<1x8x128xi32> to vector<8x128xi32>
    %178 = arith.cmpi eq, %175, %177 : vector<8x128xi32>
    %179 = arith.andi %173, %178 : vector<8x128xi1>
    %c8_160 = arith.constant 8 : index
    %c0_161 = arith.constant 0 : index
    %c0_162 = arith.constant 0 : index
    %180 = vector.load %arg1[%c8_160, %c0_161, %c0_162] : memref<16x8x128xi32, #tpu.memory_space<vmem>>, vector<1x8x128xi32>
    %181 = vector.shape_cast %180 : vector<1x8x128xi32> to vector<8x128xi32>
    %c15 = arith.constant 15 : index
    %c0_163 = arith.constant 0 : index
    %c0_164 = arith.constant 0 : index
    %182 = vector.load %arg1[%c15, %c0_163, %c0_164] : memref<16x8x128xi32, #tpu.memory_space<vmem>>, vector<1x8x128xi32>
    %183 = vector.shape_cast %182 : vector<1x8x128xi32> to vector<8x128xi32>
    %184 = arith.cmpi eq, %181, %183 : vector<8x128xi32>
    %185 = arith.andi %179, %184 : vector<8x128xi1>
    %c8_i32 = arith.constant 8 : i32
    %c0_i32_165 = arith.constant 0 : i32
    %186 = vector.broadcast %c8_i32 : i32 to vector<8x128xi32>
    %187 = vector.broadcast %c0_i32_165 : i32 to vector<8x128xi32>
    %188 = arith.select %185, %186, %187 : vector<8x128xi1>, vector<8x128xi32>
    %189 = arith.addi %144, %188 : vector<8x128xi32>
    %c0_166 = arith.constant 0 : index
    %c0_167 = arith.constant 0 : index
    %c0_168 = arith.constant 0 : index
    %190 = vector.load %arg1[%c0_166, %c0_167, %c0_168] : memref<16x8x128xi32, #tpu.memory_space<vmem>>, vector<1x8x128xi32>
    %191 = vector.shape_cast %190 : vector<1x8x128xi32> to vector<8x128xi32>
    %c1_169 = arith.constant 1 : index
    %c0_170 = arith.constant 0 : index
    %c0_171 = arith.constant 0 : index
    %192 = vector.load %arg1[%c1_169, %c0_170, %c0_171] : memref<16x8x128xi32, #tpu.memory_space<vmem>>, vector<1x8x128xi32>
    %193 = vector.shape_cast %192 : vector<1x8x128xi32> to vector<8x128xi32>
    %194 = arith.cmpi eq, %191, %193 : vector<8x128xi32>
    %c0_172 = arith.constant 0 : index
    %c0_173 = arith.constant 0 : index
    %c0_174 = arith.constant 0 : index
    %195 = vector.load %arg1[%c0_172, %c0_173, %c0_174] : memref<16x8x128xi32, #tpu.memory_space<vmem>>, vector<1x8x128xi32>
    %196 = vector.shape_cast %195 : vector<1x8x128xi32> to vector<8x128xi32>
    %c2_175 = arith.constant 2 : index
    %c0_176 = arith.constant 0 : index
    %c0_177 = arith.constant 0 : index
    %197 = vector.load %arg1[%c2_175, %c0_176, %c0_177] : memref<16x8x128xi32, #tpu.memory_space<vmem>>, vector<1x8x128xi32>
    %198 = vector.shape_cast %197 : vector<1x8x128xi32> to vector<8x128xi32>
    %199 = arith.cmpi eq, %196, %198 : vector<8x128xi32>
    %200 = arith.andi %194, %199 : vector<8x128xi1>
    %c0_178 = arith.constant 0 : index
    %c0_179 = arith.constant 0 : index
    %c0_180 = arith.constant 0 : index
    %201 = vector.load %arg1[%c0_178, %c0_179, %c0_180] : memref<16x8x128xi32, #tpu.memory_space<vmem>>, vector<1x8x128xi32>
    %202 = vector.shape_cast %201 : vector<1x8x128xi32> to vector<8x128xi32>
    %c3_181 = arith.constant 3 : index
    %c0_182 = arith.constant 0 : index
    %c0_183 = arith.constant 0 : index
    %203 = vector.load %arg1[%c3_181, %c0_182, %c0_183] : memref<16x8x128xi32, #tpu.memory_space<vmem>>, vector<1x8x128xi32>
    %204 = vector.shape_cast %203 : vector<1x8x128xi32> to vector<8x128xi32>
    %205 = arith.cmpi eq, %202, %204 : vector<8x128xi32>
    %206 = arith.andi %200, %205 : vector<8x128xi1>
    %c0_184 = arith.constant 0 : index
    %c0_185 = arith.constant 0 : index
    %c0_186 = arith.constant 0 : index
    %207 = vector.load %arg1[%c0_184, %c0_185, %c0_186] : memref<16x8x128xi32, #tpu.memory_space<vmem>>, vector<1x8x128xi32>
    %208 = vector.shape_cast %207 : vector<1x8x128xi32> to vector<8x128xi32>
    %c4_187 = arith.constant 4 : index
    %c0_188 = arith.constant 0 : index
    %c0_189 = arith.constant 0 : index
    %209 = vector.load %arg1[%c4_187, %c0_188, %c0_189] : memref<16x8x128xi32, #tpu.memory_space<vmem>>, vector<1x8x128xi32>
    %210 = vector.shape_cast %209 : vector<1x8x128xi32> to vector<8x128xi32>
    %211 = arith.cmpi ne, %208, %210 : vector<8x128xi32>
    %212 = arith.andi %206, %211 : vector<8x128xi1>
    %c0_190 = arith.constant 0 : index
    %c0_191 = arith.constant 0 : index
    %c0_192 = arith.constant 0 : index
    %213 = vector.load %arg1[%c0_190, %c0_191, %c0_192] : memref<16x8x128xi32, #tpu.memory_space<vmem>>, vector<1x8x128xi32>
    %214 = vector.shape_cast %213 : vector<1x8x128xi32> to vector<8x128xi32>
    %c5_193 = arith.constant 5 : index
    %c0_194 = arith.constant 0 : index
    %c0_195 = arith.constant 0 : index
    %215 = vector.load %arg1[%c5_193, %c0_194, %c0_195] : memref<16x8x128xi32, #tpu.memory_space<vmem>>, vector<1x8x128xi32>
    %216 = vector.shape_cast %215 : vector<1x8x128xi32> to vector<8x128xi32>
    %217 = arith.cmpi ne, %214, %216 : vector<8x128xi32>
    %218 = arith.andi %212, %217 : vector<8x128xi1>
    %c0_196 = arith.constant 0 : index
    %c0_197 = arith.constant 0 : index
    %c0_198 = arith.constant 0 : index
    %219 = vector.load %arg1[%c0_196, %c0_197, %c0_198] : memref<16x8x128xi32, #tpu.memory_space<vmem>>, vector<1x8x128xi32>
    %220 = vector.shape_cast %219 : vector<1x8x128xi32> to vector<8x128xi32>
    %c6_199 = arith.constant 6 : index
    %c0_200 = arith.constant 0 : index
    %c0_201 = arith.constant 0 : index
    %221 = vector.load %arg1[%c6_199, %c0_200, %c0_201] : memref<16x8x128xi32, #tpu.memory_space<vmem>>, vector<1x8x128xi32>
    %222 = vector.shape_cast %221 : vector<1x8x128xi32> to vector<8x128xi32>
    %223 = arith.cmpi ne, %220, %222 : vector<8x128xi32>
    %224 = arith.andi %218, %223 : vector<8x128xi1>
    %c0_202 = arith.constant 0 : index
    %c0_203 = arith.constant 0 : index
    %c0_204 = arith.constant 0 : index
    %225 = vector.load %arg1[%c0_202, %c0_203, %c0_204] : memref<16x8x128xi32, #tpu.memory_space<vmem>>, vector<1x8x128xi32>
    %226 = vector.shape_cast %225 : vector<1x8x128xi32> to vector<8x128xi32>
    %c7_205 = arith.constant 7 : index
    %c0_206 = arith.constant 0 : index
    %c0_207 = arith.constant 0 : index
    %227 = vector.load %arg1[%c7_205, %c0_206, %c0_207] : memref<16x8x128xi32, #tpu.memory_space<vmem>>, vector<1x8x128xi32>
    %228 = vector.shape_cast %227 : vector<1x8x128xi32> to vector<8x128xi32>
    %229 = arith.cmpi ne, %226, %228 : vector<8x128xi32>
    %230 = arith.andi %224, %229 : vector<8x128xi1>
    %c1_208 = arith.constant 1 : index
    %c0_209 = arith.constant 0 : index
    %c0_210 = arith.constant 0 : index
    %231 = vector.load %arg1[%c1_208, %c0_209, %c0_210] : memref<16x8x128xi32, #tpu.memory_space<vmem>>, vector<1x8x128xi32>
    %232 = vector.shape_cast %231 : vector<1x8x128xi32> to vector<8x128xi32>
    %c4_211 = arith.constant 4 : index
    %c0_212 = arith.constant 0 : index
    %c0_213 = arith.constant 0 : index
    %233 = vector.load %arg1[%c4_211, %c0_212, %c0_213] : memref<16x8x128xi32, #tpu.memory_space<vmem>>, vector<1x8x128xi32>
    %234 = vector.shape_cast %233 : vector<1x8x128xi32> to vector<8x128xi32>
    %235 = arith.cmpi ne, %232, %234 : vector<8x128xi32>
    %236 = arith.andi %230, %235 : vector<8x128xi1>
    %c1_214 = arith.constant 1 : index
    %c0_215 = arith.constant 0 : index
    %c0_216 = arith.constant 0 : index
    %237 = vector.load %arg1[%c1_214, %c0_215, %c0_216] : memref<16x8x128xi32, #tpu.memory_space<vmem>>, vector<1x8x128xi32>
    %238 = vector.shape_cast %237 : vector<1x8x128xi32> to vector<8x128xi32>
    %c5_217 = arith.constant 5 : index
    %c0_218 = arith.constant 0 : index
    %c0_219 = arith.constant 0 : index
    %239 = vector.load %arg1[%c5_217, %c0_218, %c0_219] : memref<16x8x128xi32, #tpu.memory_space<vmem>>, vector<1x8x128xi32>
    %240 = vector.shape_cast %239 : vector<1x8x128xi32> to vector<8x128xi32>
    %241 = arith.cmpi ne, %238, %240 : vector<8x128xi32>
    %242 = arith.andi %236, %241 : vector<8x128xi1>
    %c1_220 = arith.constant 1 : index
    %c0_221 = arith.constant 0 : index
    %c0_222 = arith.constant 0 : index
    %243 = vector.load %arg1[%c1_220, %c0_221, %c0_222] : memref<16x8x128xi32, #tpu.memory_space<vmem>>, vector<1x8x128xi32>
    %244 = vector.shape_cast %243 : vector<1x8x128xi32> to vector<8x128xi32>
    %c6_223 = arith.constant 6 : index
    %c0_224 = arith.constant 0 : index
    %c0_225 = arith.constant 0 : index
    %245 = vector.load %arg1[%c6_223, %c0_224, %c0_225] : memref<16x8x128xi32, #tpu.memory_space<vmem>>, vector<1x8x128xi32>
    %246 = vector.shape_cast %245 : vector<1x8x128xi32> to vector<8x128xi32>
    %247 = arith.cmpi ne, %244, %246 : vector<8x128xi32>
    %248 = arith.andi %242, %247 : vector<8x128xi1>
    %c1_226 = arith.constant 1 : index
    %c0_227 = arith.constant 0 : index
    %c0_228 = arith.constant 0 : index
    %249 = vector.load %arg1[%c1_226, %c0_227, %c0_228] : memref<16x8x128xi32, #tpu.memory_space<vmem>>, vector<1x8x128xi32>
    %250 = vector.shape_cast %249 : vector<1x8x128xi32> to vector<8x128xi32>
    %c7_229 = arith.constant 7 : index
    %c0_230 = arith.constant 0 : index
    %c0_231 = arith.constant 0 : index
    %251 = vector.load %arg1[%c7_229, %c0_230, %c0_231] : memref<16x8x128xi32, #tpu.memory_space<vmem>>, vector<1x8x128xi32>
    %252 = vector.shape_cast %251 : vector<1x8x128xi32> to vector<8x128xi32>
    %253 = arith.cmpi ne, %250, %252 : vector<8x128xi32>
    %254 = arith.andi %248, %253 : vector<8x128xi1>
    %c2_232 = arith.constant 2 : index
    %c0_233 = arith.constant 0 : index
    %c0_234 = arith.constant 0 : index
    %255 = vector.load %arg1[%c2_232, %c0_233, %c0_234] : memref<16x8x128xi32, #tpu.memory_space<vmem>>, vector<1x8x128xi32>
    %256 = vector.shape_cast %255 : vector<1x8x128xi32> to vector<8x128xi32>
    %c4_235 = arith.constant 4 : index
    %c0_236 = arith.constant 0 : index
    %c0_237 = arith.constant 0 : index
    %257 = vector.load %arg1[%c4_235, %c0_236, %c0_237] : memref<16x8x128xi32, #tpu.memory_space<vmem>>, vector<1x8x128xi32>
    %258 = vector.shape_cast %257 : vector<1x8x128xi32> to vector<8x128xi32>
    %259 = arith.cmpi ne, %256, %258 : vector<8x128xi32>
    %260 = arith.andi %254, %259 : vector<8x128xi1>
    %c2_238 = arith.constant 2 : index
    %c0_239 = arith.constant 0 : index
    %c0_240 = arith.constant 0 : index
    %261 = vector.load %arg1[%c2_238, %c0_239, %c0_240] : memref<16x8x128xi32, #tpu.memory_space<vmem>>, vector<1x8x128xi32>
    %262 = vector.shape_cast %261 : vector<1x8x128xi32> to vector<8x128xi32>
    %c5_241 = arith.constant 5 : index
    %c0_242 = arith.constant 0 : index
    %c0_243 = arith.constant 0 : index
    %263 = vector.load %arg1[%c5_241, %c0_242, %c0_243] : memref<16x8x128xi32, #tpu.memory_space<vmem>>, vector<1x8x128xi32>
    %264 = vector.shape_cast %263 : vector<1x8x128xi32> to vector<8x128xi32>
    %265 = arith.cmpi ne, %262, %264 : vector<8x128xi32>
    %266 = arith.andi %260, %265 : vector<8x128xi1>
    %c2_244 = arith.constant 2 : index
    %c0_245 = arith.constant 0 : index
    %c0_246 = arith.constant 0 : index
    %267 = vector.load %arg1[%c2_244, %c0_245, %c0_246] : memref<16x8x128xi32, #tpu.memory_space<vmem>>, vector<1x8x128xi32>
    %268 = vector.shape_cast %267 : vector<1x8x128xi32> to vector<8x128xi32>
    %c6_247 = arith.constant 6 : index
    %c0_248 = arith.constant 0 : index
    %c0_249 = arith.constant 0 : index
    %269 = vector.load %arg1[%c6_247, %c0_248, %c0_249] : memref<16x8x128xi32, #tpu.memory_space<vmem>>, vector<1x8x128xi32>
    %270 = vector.shape_cast %269 : vector<1x8x128xi32> to vector<8x128xi32>
    %271 = arith.cmpi ne, %268, %270 : vector<8x128xi32>
    %272 = arith.andi %266, %271 : vector<8x128xi1>
    %c2_250 = arith.constant 2 : index
    %c0_251 = arith.constant 0 : index
    %c0_252 = arith.constant 0 : index
    %273 = vector.load %arg1[%c2_250, %c0_251, %c0_252] : memref<16x8x128xi32, #tpu.memory_space<vmem>>, vector<1x8x128xi32>
    %274 = vector.shape_cast %273 : vector<1x8x128xi32> to vector<8x128xi32>
    %c7_253 = arith.constant 7 : index
    %c0_254 = arith.constant 0 : index
    %c0_255 = arith.constant 0 : index
    %275 = vector.load %arg1[%c7_253, %c0_254, %c0_255] : memref<16x8x128xi32, #tpu.memory_space<vmem>>, vector<1x8x128xi32>
    %276 = vector.shape_cast %275 : vector<1x8x128xi32> to vector<8x128xi32>
    %277 = arith.cmpi ne, %274, %276 : vector<8x128xi32>
    %278 = arith.andi %272, %277 : vector<8x128xi1>
    %c3_256 = arith.constant 3 : index
    %c0_257 = arith.constant 0 : index
    %c0_258 = arith.constant 0 : index
    %279 = vector.load %arg1[%c3_256, %c0_257, %c0_258] : memref<16x8x128xi32, #tpu.memory_space<vmem>>, vector<1x8x128xi32>
    %280 = vector.shape_cast %279 : vector<1x8x128xi32> to vector<8x128xi32>
    %c4_259 = arith.constant 4 : index
    %c0_260 = arith.constant 0 : index
    %c0_261 = arith.constant 0 : index
    %281 = vector.load %arg1[%c4_259, %c0_260, %c0_261] : memref<16x8x128xi32, #tpu.memory_space<vmem>>, vector<1x8x128xi32>
    %282 = vector.shape_cast %281 : vector<1x8x128xi32> to vector<8x128xi32>
    %283 = arith.cmpi ne, %280, %282 : vector<8x128xi32>
    %284 = arith.andi %278, %283 : vector<8x128xi1>
    %c3_262 = arith.constant 3 : index
    %c0_263 = arith.constant 0 : index
    %c0_264 = arith.constant 0 : index
    %285 = vector.load %arg1[%c3_262, %c0_263, %c0_264] : memref<16x8x128xi32, #tpu.memory_space<vmem>>, vector<1x8x128xi32>
    %286 = vector.shape_cast %285 : vector<1x8x128xi32> to vector<8x128xi32>
    %c5_265 = arith.constant 5 : index
    %c0_266 = arith.constant 0 : index
    %c0_267 = arith.constant 0 : index
    %287 = vector.load %arg1[%c5_265, %c0_266, %c0_267] : memref<16x8x128xi32, #tpu.memory_space<vmem>>, vector<1x8x128xi32>
    %288 = vector.shape_cast %287 : vector<1x8x128xi32> to vector<8x128xi32>
    %289 = arith.cmpi ne, %286, %288 : vector<8x128xi32>
    %290 = arith.andi %284, %289 : vector<8x128xi1>
    %c3_268 = arith.constant 3 : index
    %c0_269 = arith.constant 0 : index
    %c0_270 = arith.constant 0 : index
    %291 = vector.load %arg1[%c3_268, %c0_269, %c0_270] : memref<16x8x128xi32, #tpu.memory_space<vmem>>, vector<1x8x128xi32>
    %292 = vector.shape_cast %291 : vector<1x8x128xi32> to vector<8x128xi32>
    %c6_271 = arith.constant 6 : index
    %c0_272 = arith.constant 0 : index
    %c0_273 = arith.constant 0 : index
    %293 = vector.load %arg1[%c6_271, %c0_272, %c0_273] : memref<16x8x128xi32, #tpu.memory_space<vmem>>, vector<1x8x128xi32>
    %294 = vector.shape_cast %293 : vector<1x8x128xi32> to vector<8x128xi32>
    %295 = arith.cmpi ne, %292, %294 : vector<8x128xi32>
    %296 = arith.andi %290, %295 : vector<8x128xi1>
    %c3_274 = arith.constant 3 : index
    %c0_275 = arith.constant 0 : index
    %c0_276 = arith.constant 0 : index
    %297 = vector.load %arg1[%c3_274, %c0_275, %c0_276] : memref<16x8x128xi32, #tpu.memory_space<vmem>>, vector<1x8x128xi32>
    %298 = vector.shape_cast %297 : vector<1x8x128xi32> to vector<8x128xi32>
    %c7_277 = arith.constant 7 : index
    %c0_278 = arith.constant 0 : index
    %c0_279 = arith.constant 0 : index
    %299 = vector.load %arg1[%c7_277, %c0_278, %c0_279] : memref<16x8x128xi32, #tpu.memory_space<vmem>>, vector<1x8x128xi32>
    %300 = vector.shape_cast %299 : vector<1x8x128xi32> to vector<8x128xi32>
    %301 = arith.cmpi ne, %298, %300 : vector<8x128xi32>
    %302 = arith.andi %296, %301 : vector<8x128xi1>
    %c16_i32 = arith.constant 16 : i32
    %c0_i32_280 = arith.constant 0 : i32
    %303 = vector.broadcast %c16_i32 : i32 to vector<8x128xi32>
    %304 = vector.broadcast %c0_i32_280 : i32 to vector<8x128xi32>
    %305 = arith.select %302, %303, %304 : vector<8x128xi1>, vector<8x128xi32>
    %306 = arith.addi %189, %305 : vector<8x128xi32>
    %c0_281 = arith.constant 0 : index
    %c0_282 = arith.constant 0 : index
    %c0_283 = arith.constant 0 : index
    %307 = vector.load %arg1[%c0_281, %c0_282, %c0_283] : memref<16x8x128xi32, #tpu.memory_space<vmem>>, vector<1x8x128xi32>
    %308 = vector.shape_cast %307 : vector<1x8x128xi32> to vector<8x128xi32>
    %c4_284 = arith.constant 4 : index
    %c0_285 = arith.constant 0 : index
    %c0_286 = arith.constant 0 : index
    %309 = vector.load %arg1[%c4_284, %c0_285, %c0_286] : memref<16x8x128xi32, #tpu.memory_space<vmem>>, vector<1x8x128xi32>
    %310 = vector.shape_cast %309 : vector<1x8x128xi32> to vector<8x128xi32>
    %311 = arith.cmpi ne, %308, %310 : vector<8x128xi32>
    %c0_287 = arith.constant 0 : index
    %c0_288 = arith.constant 0 : index
    %c0_289 = arith.constant 0 : index
    %312 = vector.load %arg1[%c0_287, %c0_288, %c0_289] : memref<16x8x128xi32, #tpu.memory_space<vmem>>, vector<1x8x128xi32>
    %313 = vector.shape_cast %312 : vector<1x8x128xi32> to vector<8x128xi32>
    %c5_290 = arith.constant 5 : index
    %c0_291 = arith.constant 0 : index
    %c0_292 = arith.constant 0 : index
    %314 = vector.load %arg1[%c5_290, %c0_291, %c0_292] : memref<16x8x128xi32, #tpu.memory_space<vmem>>, vector<1x8x128xi32>
    %315 = vector.shape_cast %314 : vector<1x8x128xi32> to vector<8x128xi32>
    %316 = arith.cmpi ne, %313, %315 : vector<8x128xi32>
    %317 = arith.andi %311, %316 : vector<8x128xi1>
    %c0_293 = arith.constant 0 : index
    %c0_294 = arith.constant 0 : index
    %c0_295 = arith.constant 0 : index
    %318 = vector.load %arg1[%c0_293, %c0_294, %c0_295] : memref<16x8x128xi32, #tpu.memory_space<vmem>>, vector<1x8x128xi32>
    %319 = vector.shape_cast %318 : vector<1x8x128xi32> to vector<8x128xi32>
    %c6_296 = arith.constant 6 : index
    %c0_297 = arith.constant 0 : index
    %c0_298 = arith.constant 0 : index
    %320 = vector.load %arg1[%c6_296, %c0_297, %c0_298] : memref<16x8x128xi32, #tpu.memory_space<vmem>>, vector<1x8x128xi32>
    %321 = vector.shape_cast %320 : vector<1x8x128xi32> to vector<8x128xi32>
    %322 = arith.cmpi ne, %319, %321 : vector<8x128xi32>
    %323 = arith.andi %317, %322 : vector<8x128xi1>
    %c0_299 = arith.constant 0 : index
    %c0_300 = arith.constant 0 : index
    %c0_301 = arith.constant 0 : index
    %324 = vector.load %arg1[%c0_299, %c0_300, %c0_301] : memref<16x8x128xi32, #tpu.memory_space<vmem>>, vector<1x8x128xi32>
    %325 = vector.shape_cast %324 : vector<1x8x128xi32> to vector<8x128xi32>
    %c7_302 = arith.constant 7 : index
    %c0_303 = arith.constant 0 : index
    %c0_304 = arith.constant 0 : index
    %326 = vector.load %arg1[%c7_302, %c0_303, %c0_304] : memref<16x8x128xi32, #tpu.memory_space<vmem>>, vector<1x8x128xi32>
    %327 = vector.shape_cast %326 : vector<1x8x128xi32> to vector<8x128xi32>
    %328 = arith.cmpi ne, %325, %327 : vector<8x128xi32>
    %329 = arith.andi %323, %328 : vector<8x128xi1>
    %c1_305 = arith.constant 1 : index
    %c0_306 = arith.constant 0 : index
    %c0_307 = arith.constant 0 : index
    %330 = vector.load %arg1[%c1_305, %c0_306, %c0_307] : memref<16x8x128xi32, #tpu.memory_space<vmem>>, vector<1x8x128xi32>
    %331 = vector.shape_cast %330 : vector<1x8x128xi32> to vector<8x128xi32>
    %c4_308 = arith.constant 4 : index
    %c0_309 = arith.constant 0 : index
    %c0_310 = arith.constant 0 : index
    %332 = vector.load %arg1[%c4_308, %c0_309, %c0_310] : memref<16x8x128xi32, #tpu.memory_space<vmem>>, vector<1x8x128xi32>
    %333 = vector.shape_cast %332 : vector<1x8x128xi32> to vector<8x128xi32>
    %334 = arith.cmpi ne, %331, %333 : vector<8x128xi32>
    %335 = arith.andi %329, %334 : vector<8x128xi1>
    %c1_311 = arith.constant 1 : index
    %c0_312 = arith.constant 0 : index
    %c0_313 = arith.constant 0 : index
    %336 = vector.load %arg1[%c1_311, %c0_312, %c0_313] : memref<16x8x128xi32, #tpu.memory_space<vmem>>, vector<1x8x128xi32>
    %337 = vector.shape_cast %336 : vector<1x8x128xi32> to vector<8x128xi32>
    %c5_314 = arith.constant 5 : index
    %c0_315 = arith.constant 0 : index
    %c0_316 = arith.constant 0 : index
    %338 = vector.load %arg1[%c5_314, %c0_315, %c0_316] : memref<16x8x128xi32, #tpu.memory_space<vmem>>, vector<1x8x128xi32>
    %339 = vector.shape_cast %338 : vector<1x8x128xi32> to vector<8x128xi32>
    %340 = arith.cmpi ne, %337, %339 : vector<8x128xi32>
    %341 = arith.andi %335, %340 : vector<8x128xi1>
    %c1_317 = arith.constant 1 : index
    %c0_318 = arith.constant 0 : index
    %c0_319 = arith.constant 0 : index
    %342 = vector.load %arg1[%c1_317, %c0_318, %c0_319] : memref<16x8x128xi32, #tpu.memory_space<vmem>>, vector<1x8x128xi32>
    %343 = vector.shape_cast %342 : vector<1x8x128xi32> to vector<8x128xi32>
    %c6_320 = arith.constant 6 : index
    %c0_321 = arith.constant 0 : index
    %c0_322 = arith.constant 0 : index
    %344 = vector.load %arg1[%c6_320, %c0_321, %c0_322] : memref<16x8x128xi32, #tpu.memory_space<vmem>>, vector<1x8x128xi32>
    %345 = vector.shape_cast %344 : vector<1x8x128xi32> to vector<8x128xi32>
    %346 = arith.cmpi ne, %343, %345 : vector<8x128xi32>
    %347 = arith.andi %341, %346 : vector<8x128xi1>
    %c1_323 = arith.constant 1 : index
    %c0_324 = arith.constant 0 : index
    %c0_325 = arith.constant 0 : index
    %348 = vector.load %arg1[%c1_323, %c0_324, %c0_325] : memref<16x8x128xi32, #tpu.memory_space<vmem>>, vector<1x8x128xi32>
    %349 = vector.shape_cast %348 : vector<1x8x128xi32> to vector<8x128xi32>
    %c7_326 = arith.constant 7 : index
    %c0_327 = arith.constant 0 : index
    %c0_328 = arith.constant 0 : index
    %350 = vector.load %arg1[%c7_326, %c0_327, %c0_328] : memref<16x8x128xi32, #tpu.memory_space<vmem>>, vector<1x8x128xi32>
    %351 = vector.shape_cast %350 : vector<1x8x128xi32> to vector<8x128xi32>
    %352 = arith.cmpi ne, %349, %351 : vector<8x128xi32>
    %353 = arith.andi %347, %352 : vector<8x128xi1>
    %c2_329 = arith.constant 2 : index
    %c0_330 = arith.constant 0 : index
    %c0_331 = arith.constant 0 : index
    %354 = vector.load %arg1[%c2_329, %c0_330, %c0_331] : memref<16x8x128xi32, #tpu.memory_space<vmem>>, vector<1x8x128xi32>
    %355 = vector.shape_cast %354 : vector<1x8x128xi32> to vector<8x128xi32>
    %c4_332 = arith.constant 4 : index
    %c0_333 = arith.constant 0 : index
    %c0_334 = arith.constant 0 : index
    %356 = vector.load %arg1[%c4_332, %c0_333, %c0_334] : memref<16x8x128xi32, #tpu.memory_space<vmem>>, vector<1x8x128xi32>
    %357 = vector.shape_cast %356 : vector<1x8x128xi32> to vector<8x128xi32>
    %358 = arith.cmpi ne, %355, %357 : vector<8x128xi32>
    %359 = arith.andi %353, %358 : vector<8x128xi1>
    %c2_335 = arith.constant 2 : index
    %c0_336 = arith.constant 0 : index
    %c0_337 = arith.constant 0 : index
    %360 = vector.load %arg1[%c2_335, %c0_336, %c0_337] : memref<16x8x128xi32, #tpu.memory_space<vmem>>, vector<1x8x128xi32>
    %361 = vector.shape_cast %360 : vector<1x8x128xi32> to vector<8x128xi32>
    %c5_338 = arith.constant 5 : index
    %c0_339 = arith.constant 0 : index
    %c0_340 = arith.constant 0 : index
    %362 = vector.load %arg1[%c5_338, %c0_339, %c0_340] : memref<16x8x128xi32, #tpu.memory_space<vmem>>, vector<1x8x128xi32>
    %363 = vector.shape_cast %362 : vector<1x8x128xi32> to vector<8x128xi32>
    %364 = arith.cmpi ne, %361, %363 : vector<8x128xi32>
    %365 = arith.andi %359, %364 : vector<8x128xi1>
    %c2_341 = arith.constant 2 : index
    %c0_342 = arith.constant 0 : index
    %c0_343 = arith.constant 0 : index
    %366 = vector.load %arg1[%c2_341, %c0_342, %c0_343] : memref<16x8x128xi32, #tpu.memory_space<vmem>>, vector<1x8x128xi32>
    %367 = vector.shape_cast %366 : vector<1x8x128xi32> to vector<8x128xi32>
    %c6_344 = arith.constant 6 : index
    %c0_345 = arith.constant 0 : index
    %c0_346 = arith.constant 0 : index
    %368 = vector.load %arg1[%c6_344, %c0_345, %c0_346] : memref<16x8x128xi32, #tpu.memory_space<vmem>>, vector<1x8x128xi32>
    %369 = vector.shape_cast %368 : vector<1x8x128xi32> to vector<8x128xi32>
    %370 = arith.cmpi ne, %367, %369 : vector<8x128xi32>
    %371 = arith.andi %365, %370 : vector<8x128xi1>
    %c2_347 = arith.constant 2 : index
    %c0_348 = arith.constant 0 : index
    %c0_349 = arith.constant 0 : index
    %372 = vector.load %arg1[%c2_347, %c0_348, %c0_349] : memref<16x8x128xi32, #tpu.memory_space<vmem>>, vector<1x8x128xi32>
    %373 = vector.shape_cast %372 : vector<1x8x128xi32> to vector<8x128xi32>
    %c7_350 = arith.constant 7 : index
    %c0_351 = arith.constant 0 : index
    %c0_352 = arith.constant 0 : index
    %374 = vector.load %arg1[%c7_350, %c0_351, %c0_352] : memref<16x8x128xi32, #tpu.memory_space<vmem>>, vector<1x8x128xi32>
    %375 = vector.shape_cast %374 : vector<1x8x128xi32> to vector<8x128xi32>
    %376 = arith.cmpi ne, %373, %375 : vector<8x128xi32>
    %377 = arith.andi %371, %376 : vector<8x128xi1>
    %c3_353 = arith.constant 3 : index
    %c0_354 = arith.constant 0 : index
    %c0_355 = arith.constant 0 : index
    %378 = vector.load %arg1[%c3_353, %c0_354, %c0_355] : memref<16x8x128xi32, #tpu.memory_space<vmem>>, vector<1x8x128xi32>
    %379 = vector.shape_cast %378 : vector<1x8x128xi32> to vector<8x128xi32>
    %c4_356 = arith.constant 4 : index
    %c0_357 = arith.constant 0 : index
    %c0_358 = arith.constant 0 : index
    %380 = vector.load %arg1[%c4_356, %c0_357, %c0_358] : memref<16x8x128xi32, #tpu.memory_space<vmem>>, vector<1x8x128xi32>
    %381 = vector.shape_cast %380 : vector<1x8x128xi32> to vector<8x128xi32>
    %382 = arith.cmpi ne, %379, %381 : vector<8x128xi32>
    %383 = arith.andi %377, %382 : vector<8x128xi1>
    %c3_359 = arith.constant 3 : index
    %c0_360 = arith.constant 0 : index
    %c0_361 = arith.constant 0 : index
    %384 = vector.load %arg1[%c3_359, %c0_360, %c0_361] : memref<16x8x128xi32, #tpu.memory_space<vmem>>, vector<1x8x128xi32>
    %385 = vector.shape_cast %384 : vector<1x8x128xi32> to vector<8x128xi32>
    %c5_362 = arith.constant 5 : index
    %c0_363 = arith.constant 0 : index
    %c0_364 = arith.constant 0 : index
    %386 = vector.load %arg1[%c5_362, %c0_363, %c0_364] : memref<16x8x128xi32, #tpu.memory_space<vmem>>, vector<1x8x128xi32>
    %387 = vector.shape_cast %386 : vector<1x8x128xi32> to vector<8x128xi32>
    %388 = arith.cmpi ne, %385, %387 : vector<8x128xi32>
    %389 = arith.andi %383, %388 : vector<8x128xi1>
    %c3_365 = arith.constant 3 : index
    %c0_366 = arith.constant 0 : index
    %c0_367 = arith.constant 0 : index
    %390 = vector.load %arg1[%c3_365, %c0_366, %c0_367] : memref<16x8x128xi32, #tpu.memory_space<vmem>>, vector<1x8x128xi32>
    %391 = vector.shape_cast %390 : vector<1x8x128xi32> to vector<8x128xi32>
    %c6_368 = arith.constant 6 : index
    %c0_369 = arith.constant 0 : index
    %c0_370 = arith.constant 0 : index
    %392 = vector.load %arg1[%c6_368, %c0_369, %c0_370] : memref<16x8x128xi32, #tpu.memory_space<vmem>>, vector<1x8x128xi32>
    %393 = vector.shape_cast %392 : vector<1x8x128xi32> to vector<8x128xi32>
    %394 = arith.cmpi ne, %391, %393 : vector<8x128xi32>
    %395 = arith.andi %389, %394 : vector<8x128xi1>
    %c3_371 = arith.constant 3 : index
    %c0_372 = arith.constant 0 : index
    %c0_373 = arith.constant 0 : index
    %396 = vector.load %arg1[%c3_371, %c0_372, %c0_373] : memref<16x8x128xi32, #tpu.memory_space<vmem>>, vector<1x8x128xi32>
    %397 = vector.shape_cast %396 : vector<1x8x128xi32> to vector<8x128xi32>
    %c7_374 = arith.constant 7 : index
    %c0_375 = arith.constant 0 : index
    %c0_376 = arith.constant 0 : index
    %398 = vector.load %arg1[%c7_374, %c0_375, %c0_376] : memref<16x8x128xi32, #tpu.memory_space<vmem>>, vector<1x8x128xi32>
    %399 = vector.shape_cast %398 : vector<1x8x128xi32> to vector<8x128xi32>
    %400 = arith.cmpi ne, %397, %399 : vector<8x128xi32>
    %401 = arith.andi %395, %400 : vector<8x128xi1>
    %c32_i32 = arith.constant 32 : i32
    %c0_i32_377 = arith.constant 0 : i32
    %402 = vector.broadcast %c32_i32 : i32 to vector<8x128xi32>
    %403 = vector.broadcast %c0_i32_377 : i32 to vector<8x128xi32>
    %404 = arith.select %401, %402, %403 : vector<8x128xi1>, vector<8x128xi32>
    %405 = arith.addi %306, %404 : vector<8x128xi32>
    %c4_378 = arith.constant 4 : index
    %c0_379 = arith.constant 0 : index
    %c0_380 = arith.constant 0 : index
    %406 = vector.load %arg1[%c4_378, %c0_379, %c0_380] : memref<16x8x128xi32, #tpu.memory_space<vmem>>, vector<1x8x128xi32>
    %407 = vector.shape_cast %406 : vector<1x8x128xi32> to vector<8x128xi32>
    %c5_381 = arith.constant 5 : index
    %c0_382 = arith.constant 0 : index
    %c0_383 = arith.constant 0 : index
    %408 = vector.load %arg1[%c5_381, %c0_382, %c0_383] : memref<16x8x128xi32, #tpu.memory_space<vmem>>, vector<1x8x128xi32>
    %409 = vector.shape_cast %408 : vector<1x8x128xi32> to vector<8x128xi32>
    %410 = arith.cmpi eq, %407, %409 : vector<8x128xi32>
    %c4_384 = arith.constant 4 : index
    %c0_385 = arith.constant 0 : index
    %c0_386 = arith.constant 0 : index
    %411 = vector.load %arg1[%c4_384, %c0_385, %c0_386] : memref<16x8x128xi32, #tpu.memory_space<vmem>>, vector<1x8x128xi32>
    %412 = vector.shape_cast %411 : vector<1x8x128xi32> to vector<8x128xi32>
    %c6_387 = arith.constant 6 : index
    %c0_388 = arith.constant 0 : index
    %c0_389 = arith.constant 0 : index
    %413 = vector.load %arg1[%c6_387, %c0_388, %c0_389] : memref<16x8x128xi32, #tpu.memory_space<vmem>>, vector<1x8x128xi32>
    %414 = vector.shape_cast %413 : vector<1x8x128xi32> to vector<8x128xi32>
    %415 = arith.cmpi eq, %412, %414 : vector<8x128xi32>
    %416 = arith.andi %410, %415 : vector<8x128xi1>
    %c4_390 = arith.constant 4 : index
    %c0_391 = arith.constant 0 : index
    %c0_392 = arith.constant 0 : index
    %417 = vector.load %arg1[%c4_390, %c0_391, %c0_392] : memref<16x8x128xi32, #tpu.memory_space<vmem>>, vector<1x8x128xi32>
    %418 = vector.shape_cast %417 : vector<1x8x128xi32> to vector<8x128xi32>
    %c7_393 = arith.constant 7 : index
    %c0_394 = arith.constant 0 : index
    %c0_395 = arith.constant 0 : index
    %419 = vector.load %arg1[%c7_393, %c0_394, %c0_395] : memref<16x8x128xi32, #tpu.memory_space<vmem>>, vector<1x8x128xi32>
    %420 = vector.shape_cast %419 : vector<1x8x128xi32> to vector<8x128xi32>
    %421 = arith.cmpi eq, %418, %420 : vector<8x128xi32>
    %422 = arith.andi %416, %421 : vector<8x128xi1>
    %c64_i32 = arith.constant 64 : i32
    %c0_i32_396 = arith.constant 0 : i32
    %423 = vector.broadcast %c64_i32 : i32 to vector<8x128xi32>
    %424 = vector.broadcast %c0_i32_396 : i32 to vector<8x128xi32>
    %425 = arith.select %422, %423, %424 : vector<8x128xi1>, vector<8x128xi32>
    %426 = arith.addi %405, %425 : vector<8x128xi32>
    %c0_397 = arith.constant 0 : index
    %c0_398 = arith.constant 0 : index
    %c0_399 = arith.constant 0 : index
    %427 = vector.load %arg1[%c0_397, %c0_398, %c0_399] : memref<16x8x128xi32, #tpu.memory_space<vmem>>, vector<1x8x128xi32>
    %428 = vector.shape_cast %427 : vector<1x8x128xi32> to vector<8x128xi32>
    %c4_400 = arith.constant 4 : index
    %c0_401 = arith.constant 0 : index
    %c0_402 = arith.constant 0 : index
    %429 = vector.load %arg1[%c4_400, %c0_401, %c0_402] : memref<16x8x128xi32, #tpu.memory_space<vmem>>, vector<1x8x128xi32>
    %430 = vector.shape_cast %429 : vector<1x8x128xi32> to vector<8x128xi32>
    %431 = arith.cmpi eq, %428, %430 : vector<8x128xi32>
    %c0_403 = arith.constant 0 : index
    %c0_404 = arith.constant 0 : index
    %c0_405 = arith.constant 0 : index
    %432 = vector.load %arg1[%c0_403, %c0_404, %c0_405] : memref<16x8x128xi32, #tpu.memory_space<vmem>>, vector<1x8x128xi32>
    %433 = vector.shape_cast %432 : vector<1x8x128xi32> to vector<8x128xi32>
    %c5_406 = arith.constant 5 : index
    %c0_407 = arith.constant 0 : index
    %c0_408 = arith.constant 0 : index
    %434 = vector.load %arg1[%c5_406, %c0_407, %c0_408] : memref<16x8x128xi32, #tpu.memory_space<vmem>>, vector<1x8x128xi32>
    %435 = vector.shape_cast %434 : vector<1x8x128xi32> to vector<8x128xi32>
    %436 = arith.cmpi eq, %433, %435 : vector<8x128xi32>
    %437 = arith.andi %431, %436 : vector<8x128xi1>
    %c0_409 = arith.constant 0 : index
    %c0_410 = arith.constant 0 : index
    %c0_411 = arith.constant 0 : index
    %438 = vector.load %arg1[%c0_409, %c0_410, %c0_411] : memref<16x8x128xi32, #tpu.memory_space<vmem>>, vector<1x8x128xi32>
    %439 = vector.shape_cast %438 : vector<1x8x128xi32> to vector<8x128xi32>
    %c6_412 = arith.constant 6 : index
    %c0_413 = arith.constant 0 : index
    %c0_414 = arith.constant 0 : index
    %440 = vector.load %arg1[%c6_412, %c0_413, %c0_414] : memref<16x8x128xi32, #tpu.memory_space<vmem>>, vector<1x8x128xi32>
    %441 = vector.shape_cast %440 : vector<1x8x128xi32> to vector<8x128xi32>
    %442 = arith.cmpi eq, %439, %441 : vector<8x128xi32>
    %443 = arith.andi %437, %442 : vector<8x128xi1>
    %c0_415 = arith.constant 0 : index
    %c0_416 = arith.constant 0 : index
    %c0_417 = arith.constant 0 : index
    %444 = vector.load %arg1[%c0_415, %c0_416, %c0_417] : memref<16x8x128xi32, #tpu.memory_space<vmem>>, vector<1x8x128xi32>
    %445 = vector.shape_cast %444 : vector<1x8x128xi32> to vector<8x128xi32>
    %c7_418 = arith.constant 7 : index
    %c0_419 = arith.constant 0 : index
    %c0_420 = arith.constant 0 : index
    %446 = vector.load %arg1[%c7_418, %c0_419, %c0_420] : memref<16x8x128xi32, #tpu.memory_space<vmem>>, vector<1x8x128xi32>
    %447 = vector.shape_cast %446 : vector<1x8x128xi32> to vector<8x128xi32>
    %448 = arith.cmpi eq, %445, %447 : vector<8x128xi32>
    %449 = arith.andi %443, %448 : vector<8x128xi1>
    %c1_421 = arith.constant 1 : index
    %c0_422 = arith.constant 0 : index
    %c0_423 = arith.constant 0 : index
    %450 = vector.load %arg1[%c1_421, %c0_422, %c0_423] : memref<16x8x128xi32, #tpu.memory_space<vmem>>, vector<1x8x128xi32>
    %451 = vector.shape_cast %450 : vector<1x8x128xi32> to vector<8x128xi32>
    %c4_424 = arith.constant 4 : index
    %c0_425 = arith.constant 0 : index
    %c0_426 = arith.constant 0 : index
    %452 = vector.load %arg1[%c4_424, %c0_425, %c0_426] : memref<16x8x128xi32, #tpu.memory_space<vmem>>, vector<1x8x128xi32>
    %453 = vector.shape_cast %452 : vector<1x8x128xi32> to vector<8x128xi32>
    %454 = arith.cmpi eq, %451, %453 : vector<8x128xi32>
    %455 = arith.andi %449, %454 : vector<8x128xi1>
    %c2_427 = arith.constant 2 : index
    %c0_428 = arith.constant 0 : index
    %c0_429 = arith.constant 0 : index
    %456 = vector.load %arg1[%c2_427, %c0_428, %c0_429] : memref<16x8x128xi32, #tpu.memory_space<vmem>>, vector<1x8x128xi32>
    %457 = vector.shape_cast %456 : vector<1x8x128xi32> to vector<8x128xi32>
    %c4_430 = arith.constant 4 : index
    %c0_431 = arith.constant 0 : index
    %c0_432 = arith.constant 0 : index
    %458 = vector.load %arg1[%c4_430, %c0_431, %c0_432] : memref<16x8x128xi32, #tpu.memory_space<vmem>>, vector<1x8x128xi32>
    %459 = vector.shape_cast %458 : vector<1x8x128xi32> to vector<8x128xi32>
    %460 = arith.cmpi eq, %457, %459 : vector<8x128xi32>
    %461 = arith.andi %455, %460 : vector<8x128xi1>
    %c3_433 = arith.constant 3 : index
    %c0_434 = arith.constant 0 : index
    %c0_435 = arith.constant 0 : index
    %462 = vector.load %arg1[%c3_433, %c0_434, %c0_435] : memref<16x8x128xi32, #tpu.memory_space<vmem>>, vector<1x8x128xi32>
    %463 = vector.shape_cast %462 : vector<1x8x128xi32> to vector<8x128xi32>
    %c4_436 = arith.constant 4 : index
    %c0_437 = arith.constant 0 : index
    %c0_438 = arith.constant 0 : index
    %464 = vector.load %arg1[%c4_436, %c0_437, %c0_438] : memref<16x8x128xi32, #tpu.memory_space<vmem>>, vector<1x8x128xi32>
    %465 = vector.shape_cast %464 : vector<1x8x128xi32> to vector<8x128xi32>
    %466 = arith.cmpi eq, %463, %465 : vector<8x128xi32>
    %467 = arith.andi %461, %466 : vector<8x128xi1>
    %c128_i32 = arith.constant 128 : i32
    %c0_i32_439 = arith.constant 0 : i32
    %468 = vector.broadcast %c128_i32 : i32 to vector<8x128xi32>
    %469 = vector.broadcast %c0_i32_439 : i32 to vector<8x128xi32>
    %470 = arith.select %467, %468, %469 : vector<8x128xi1>, vector<8x128xi32>
    %471 = arith.addi %426, %470 : vector<8x128xi32>
    %c0_440 = arith.constant 0 : index
    %c0_441 = arith.constant 0 : index
    %472 = vector.load %arg2[%c0_440, %c0_441] : memref<8x128xi32, #tpu.memory_space<vmem>>, vector<8x128xi32>
    tpu.vector_store %arg2[%c0_440, %c0_441], %471 {strides = array<i32>} : memref<8x128xi32, #tpu.memory_space<vmem>>, vector<8x128xi32>,
    return
  }
  func.func @transform_0(%arg0: i32) -> (i32, i32, i32) {
    %c0_i32 = arith.constant 0 : i32
    %c0_i32_0 = arith.constant 0 : i32
    %c0_i32_1 = arith.constant 0 : i32
    return %c0_i32, %arg0, %c0_i32_0 : i32, i32, i32
  }
  func.func @transform_1(%arg0: i32) -> (i32, i32) {
    %c0_i32 = arith.constant 0 : i32
    %c0_i32_0 = arith.constant 0 : i32
    return %arg0, %c0_i32 : i32, i32
  }
}

</mosaic_0001>

<bundles_post_ra>
// kernel: _forward_impl.1
= control target key start
LH: loop header
LB: loop body
LE: loop exit
PB: predicated region body
PF: predicated region fallthrough
CT: control target
= control target key end

     0   :  { %v157_v21 = vmov 0   ;;  %s423_s0 = inlined_call_operand.vmem [shape: s32[16,8,128], index: 0, kind: input, shape index: {}]   ;;  %s424_s1 = inlined_call_operand.vmem [shape: s32[8,128], index: 1, kind: output, shape index: {}]  }
   0x1   :  { %v171_v0 = vld [vmem:[%s423_s0] sm:$0xff]  ;;  %v181_v2 = vld [vmem:[%s423_s0 + $0x28] sm:$0xff]  ;;  %v190_v3 = vld [vmem:[%s423_s0 + $0x30] sm:$0xff] }
   0x2   :  { %v176_v1 = vld [vmem:[%s423_s0 + $0x20] sm:$0xff]  ;;  %vm14_vm1 = vcmp.eq.s32.totalorder %v171_v0, %v181_v2  ;;  %v195_v4 = vld [vmem:[%s423_s0 + $0x38] sm:$0xff]  ;;  %vm18_vm3 = vcmp.eq.s32.totalorder %v171_v0, %v190_v3  ;;  %v204_v5 = vld [vmem:[%s423_s0 + $0x8] sm:$0xff]  ;;  %vm437_vm9 = vcmp.ne.s32.totalorder %v171_v0, %v181_v2  ;;  %vm436_vm10 = vcmp.ne.s32.totalorder %v171_v0, %v190_v3 }
   0x3   :  { %vm11_vm0 = vcmp.eq.s32.totalorder %v171_v0, %v176_v1  ;;  %vm22_vm4 = vcmp.eq.s32.totalorder %v171_v0, %v195_v4  ;;  %vm26_vm7 = vcmp.eq.s32.totalorder %v204_v5, %v176_v1  ;;  %vm439_vm8 = vcmp.ne.s32.totalorder %v171_v0, %v176_v1  ;;  %v217_v6 = vld [vmem:[%s423_s0 + $0x10] sm:$0xff]  ;;  %v268_v8 = vld [vmem:[%s423_s0 + $0x18] sm:$0xff]  ;;  %v148_v9 = vld [vmem:[%s423_s0 + $0x40] sm:$0xff] }
   0x4   :  { %vm15_vm2 = vmand %vm11_vm0, %vm14_vm1  ;;  %vm435_vm12 = vcmp.ne.s32.totalorder %v171_v0, %v195_v4  ;;  %vm30_vm13 = vcmp.eq.s32.totalorder %v217_v6, %v176_v1  ;;  %vm434_vm15 = vcmp.ne.s32.totalorder %v204_v5, %v176_v1  ;;  %vm431_vm1 = vcmp.ne.s32.totalorder %v204_v5, %v181_v2  ;;  %v149_v10 = vld [vmem:[%s423_s0 + $0x48] sm:$0xff]  ;;  %v150_v11 = vld [vmem:[%s423_s0 + $0x50] sm:$0xff] }
   0x5   :  { %vm19_vm5 = vmand %vm15_vm2, %vm18_vm3  ;;  %vm425_vm3 = vcmp.ne.s32.totalorder %v204_v5, %v190_v3  ;;  %v151_v12 = vld [vmem:[%s423_s0 + $0x58] sm:$0xff]  ;;  %v152_v13 = vld [vmem:[%s423_s0 + $0x60] sm:$0xff] }
   0x6   :  { %vm23_vm6 = vmand %vm19_vm5, %vm22_vm4  ;;  %v153_v14 = vld [vmem:[%s423_s0 + $0x68] sm:$0xff]  ;;  %v154_v15 = vld [vmem:[%s423_s0 + $0x70] sm:$0xff] }
   0x7   :  { %vm27_vm11 = vmand %vm23_vm6, %vm26_vm7  ;;  %vm426_vm6 = vcmp.ne.s32.totalorder %v204_v5, %v195_v4  ;;  %v155_v18 = vld [vmem:[%s423_s0 + $0x78] sm:$0xff] }
   0x8   :  { %vm40_vm14 = vmand %vm439_vm8, %vm437_vm9 }
   0x9   :  { %vm42_vm0 = vmand %vm40_vm14, %vm436_vm10  ;;  %vm430_vm14 = vcmp.ne.s32.totalorder %v217_v6, %v176_v1  ;;  %vm94_vm10 = vcmp.eq.s32.totalorder %v148_v9, %v154_v15 }
   0xa   :  { %vm44_vm2 = vmand %vm42_vm0, %vm435_vm12 }
   0xb   :  { %vm241_vm4 = vmand %vm27_vm11, %vm30_vm13  ;;  %vm428_vm13 = vcmp.ne.s32.totalorder %v217_v6, %v181_v2 }
   0xc   :  { %vm46_vm5 = vmand %vm44_vm2, %vm434_vm15  ;;  %vm427_vm2 = vcmp.ne.s32.totalorder %v217_v6, %v190_v3  ;;  %vm90_vm15 = vcmp.eq.s32.totalorder %v148_v9, %v153_v14 }
   0xd   :  { %vm48_vm7 = vmand %vm46_vm5, %vm431_vm1  ;;  %vm82_vm1 = vcmp.eq.s32.totalorder %v148_v9, %v151_v12 }
   0xe   :  { %vm50_vm11 = vmand %vm48_vm7, %vm425_vm3  ;;  %vm429_vm7 = vcmp.ne.s32.totalorder %v217_v6, %v195_v4 }
   0xf   :  { %vm52_vm0 = vmand %vm50_vm11, %vm426_vm6  ;;  %vm433_vm11 = vcmp.ne.s32.totalorder %v268_v8, %v176_v1 }
  0x10   :  { %vm54_vm5 = vmand %vm52_vm0, %vm430_vm14  ;;  %vm432_vm0 = vcmp.ne.s32.totalorder %v268_v8, %v181_v2  ;;  %vm78_vm14 = vcmp.eq.s32.totalorder %v148_v9, %v150_v11 }
  0x11   :  { %vm56_vm3 = vmand %vm54_vm5, %vm428_vm13  ;;  %vm438_vm13 = vcmp.ne.s32.totalorder %v268_v8, %v190_v3 }
  0x12   :  { %vm58_vm6 = vmand %vm56_vm3, %vm427_vm2  ;;  %vm34_vm3 = vcmp.eq.s32.totalorder %v268_v8, %v176_v1 }
  0x13   :  { %vm60_vm5 = vmand %vm58_vm6, %vm429_vm7  ;;  %vm75_vm7 = vcmp.eq.s32.totalorder %v148_v9, %v149_v10 }
  0x14   :  { %vm62_vm2 = vmand %vm60_vm5, %vm433_vm11 }
  0x15   :  { %vm64_vm6 = vmand %vm62_vm2, %vm432_vm0  ;;  %vm86_vm0 = vcmp.eq.s32.totalorder %v148_v9, %v152_v13 }
  0x16   :  { %vm321_vm5 = vmand %vm241_vm4, %vm34_vm3  ;;  %vm67_vm4 = vcmp.ne.s32.totalorder %v268_v8, %v195_v4 }
  0x17   :  { %vm328_vm2 = vmand %vm64_vm6, %vm438_vm13  ;;  %vm102_vm6 = vcmp.eq.s32.totalorder %v171_v0, %v204_v5  ;;  %vm103_vm13 = vcmp.eq.s32.totalorder %v171_v0, %v217_v6  ;;  %v36_v22 = vsel %vm321_vm5, 2, %v157_v21  ;;  %v134_v33 = vsel %vm321_vm5, 128, %v157_v21 }
  0x18   :  { %vm79_vm11 = vmand %vm75_vm7, %vm78_vm14  ;;  %vm98_vm14 = vcmp.eq.s32.totalorder %v148_v9, %v155_v18  ;;  %v37_v23 = vadd.s32 1, %v36_v22 }
  0x19   :  { %vm83_vm12 = vmand %vm79_vm11, %vm82_vm1  ;;  %vm105_vm1 = vcmp.eq.s32.totalorder %v171_v0, %v268_v8 }
  0x1a   :  { %vm87_vm3 = vmand %vm83_vm12, %vm86_vm0  ;;  %vm451_vm0 = vcmp.ne.s32.totalorder %v171_v0, %v181_v2 }
  0x1b   :  { %vm91_vm9 = vmand %vm87_vm3, %vm90_vm15 }
  0x1c   :  { %vm95_vm8 = vmand %vm91_vm9, %vm94_vm10  ;;  %vm450_vm9 = vcmp.ne.s32.totalorder %v171_v0, %v176_v1 }
  0x1d   :  { %vm348_vm7 = vmand %vm328_vm2, %vm67_vm4  ;;  %vm453_vm2 = vcmp.ne.s32.totalorder %v171_v0, %v195_v4 }
  0x1e   :  { %vm104_vm12 = vmand %vm102_vm6, %vm103_vm13  ;;  %vm452_vm13 = vcmp.ne.s32.totalorder %v171_v0, %v190_v3  ;;  %v69_v24 = vsel %vm348_vm7, 4, %v157_v21  ;;  %v125_v29 = vsel %vm348_vm7, 32, %v157_v21 }
  0x1f   :  { %vm352_vm15 = vmand %vm95_vm8, %vm98_vm14  ;;  %vm454_vm14 = vcmp.ne.s32.totalorder %v204_v5, %v176_v1  ;;  %v70_v25 = vadd.s32 %v69_v24, %v37_v23 }
  0x20   :  { %vm106_vm11 = vmand %vm104_vm12, %vm105_vm1  ;;  %vm455_vm12 = vcmp.ne.s32.totalorder %v204_v5, %v181_v2  ;;  %v100_v26 = vsel %vm352_vm15, 8, %v157_v21  ;;  %vm127_vm15 = vcmp.eq.s32.totalorder %v176_v1, %v181_v2 }
  0x21   :  { %vm107_vm10 = vmand %vm106_vm11, %vm450_vm9  ;;  %vm456_vm9 = vcmp.ne.s32.totalorder %v204_v5, %v190_v3  ;;  %v101_v27 = vadd.s32 %v100_v26, %v70_v25 }
  0x22   :  { %vm108_vm3 = vmand %vm107_vm10, %vm451_vm0  ;;  %vm457_vm0 = vcmp.ne.s32.totalorder %v204_v5, %v195_v4 }
  0x23   :  { %vm109_vm8 = vmand %vm108_vm3, %vm452_vm13  ;;  %vm458_vm13 = vcmp.ne.s32.totalorder %v217_v6, %v176_v1 }
  0x24   :  { %vm110_vm6 = vmand %vm109_vm8, %vm453_vm2  ;;  %vm459_vm2 = vcmp.ne.s32.totalorder %v217_v6, %v181_v2 }
  0x25   :  { %vm111_vm1 = vmand %vm110_vm6, %vm454_vm14  ;;  %vm460_vm14 = vcmp.ne.s32.totalorder %v217_v6, %v190_v3 }
  0x26   :  { %vm112_vm11 = vmand %vm111_vm1, %vm455_vm12  ;;  %vm461_vm12 = vcmp.ne.s32.totalorder %v217_v6, %v195_v4 }
  0x27   :  { %vm113_vm10 = vmand %vm112_vm11, %vm456_vm9  ;;  %vm462_vm9 = vcmp.ne.s32.totalorder %v268_v8, %v176_v1 }
  0x28   :  { %vm114_vm3 = vmand %vm113_vm10, %vm457_vm0  ;;  %vm463_vm0 = vcmp.ne.s32.totalorder %v268_v8, %v181_v2 }
  0x29   :  { %vm115_vm8 = vmand %vm114_vm3, %vm458_vm13  ;;  %vm128_vm13 = vcmp.eq.s32.totalorder %v176_v1, %v190_v3 }
  0x2a   :  { %vm116_vm6 = vmand %vm115_vm8, %vm459_vm2  ;;  %vm464_vm8 = vcmp.ne.s32.totalorder %v268_v8, %v190_v3 }
  0x2b   :  { %vm117_vm1 = vmand %vm116_vm6, %vm460_vm14  ;;  %vm130_vm6 = vcmp.eq.s32.totalorder %v176_v1, %v195_v4 }
  0x2c   :  { %vm118_vm11 = vmand %vm117_vm1, %vm461_vm12 }
  0x2d   :  { %vm119_vm10 = vmand %vm118_vm11, %vm462_vm9 }
  0x2e   :  { %vm120_vm3 = vmand %vm119_vm10, %vm463_vm0 }
  0x2f   :  { %vm121_vm2 = vmand %vm120_vm3, %vm464_vm8 }
  0x30   :  { %vm122_vm14 = vmand %vm121_vm2, %vm67_vm4 }
  0x31   :  { %v123_v28 = vsel %vm122_vm14, 16, %v157_v21  ;;  %vm129_vm1 = vmand %vm127_vm15, %vm128_vm13 }
  0x32   :  { %v124_v30 = vadd.s32 %v123_v28, %v101_v27  ;;  %vm131_vm12 = vmand %vm129_vm1, %vm130_vm6 }
  0x33   :  { %v132_v31 = vsel %vm131_vm12, 64, %v157_v21 }
  0x34   :  { %v126_v32 = vadd.s32 %v125_v29, %v124_v30 }
  0x36   :  { %v133_v34 = vadd.s32 %v132_v31, %v126_v32 }
  0x38   :  { %v135_v35 = vadd.s32 %v134_v33, %v133_v34 }
  0x3a   :  { %136 = vst [vmem:[%s424_s1] sm:$0xff] %v135_v35 }

</bundles_post_ra>
